<compile_context>
chip_gen: v7x
topology: tpu7x:2x2x1
jax: 0.10.0
libtpu: 0.0.40
codegen_flags: <defaults>
</compile_context>

<pallas_src>
import functools

import jax
import jax.numpy as jnp
from jax.experimental import pallas as pl
from jax.experimental.pallas import tpu as pltpu

K = 3                 # depthwise conv kernel size
PAD = K // 2          # "same" padding
BN_EPS = 1e-5         # PyTorch BatchNorm2d default
_SQRT_2_OVER_PI = 0.7978845608028654


def _gelu_tanh(x):
    # TODO(synk): PyTorch nn.GELU() default is the exact erf form; the tanh
    # approximation is used here for a guaranteed elementwise TPU lowering
    # (EUP tanh) and deviates at the ~1e-3 level.
    return 0.5 * x * (1.0 + jnp.tanh(_SQRT_2_OVER_PI * (x + 0.044715 * x * x * x)))


def _residual_block_kernel(x_ref, w_ref, aff_ref, o_ref, xpad_ref, *, bf16_tail):
    # x_ref:    (1, H, W, Ct)            unpadded input block (channels-last)
    # w_ref:    (K*K, Ct)                depthwise weights, tap-major, C on lanes
    # aff_ref:  (3, Ct)                  [conv_bias, bn_scale, bn_shift] (BN folded)
    # o_ref:    (1, H, W, Ct)
    # xpad_ref: (1, H+2P, W+2P, Ct) f32  VMEM scratch holding the halo'd tile
    _, H, W, Ct = o_ref.shape
    Hp, Wp = H + 2 * PAD, W + 2 * PAD

    # ---- build the "same" halo in VMEM (no HBM-padded tensor) --------------
    # Border rows/cols are re-zeroed every step (tiny, and safe under megacore
    # grid sharding); the interior is fully overwritten from the block.  The
    # center store is the single bf16->f32 upcast of the tile.
    xpad_ref[:, 0:PAD, :, :] = jnp.zeros((1, PAD, Wp, Ct), jnp.float32)
    xpad_ref[:, H + PAD:Hp, :, :] = jnp.zeros((1, PAD, Wp, Ct), jnp.float32)
    xpad_ref[:, :, 0:PAD, :] = jnp.zeros((1, Hp, PAD, Ct), jnp.float32)
    xpad_ref[:, :, W + PAD:Wp, :] = jnp.zeros((1, Hp, PAD, Ct), jnp.float32)
    xpad_ref[:, PAD:PAD + H, PAD:PAD + W, :] = x_ref[...].astype(jnp.float32)

    w = w_ref[...].astype(jnp.float32)        # (K*K, Ct)
    aff = aff_ref[...].astype(jnp.float32)    # (3, Ct)

    # ---- depthwise "same" conv ----------------------------------------------
    # 3 hoisted sublane (W-axis) slabs x 3 free major-dim (H-axis) slices,
    # instead of 9 unaligned per-tap slices.  Per-channel weight multiplies are
    # lane-aligned broadcasts; accumulation in f32.
    acc = None
    for dx in range(K):
        col = xpad_ref[:, :, dx:dx + W, :]    # (1, Hp, W, Ct): one offset read per dx
        for dy in range(K):
            term = col[:, dy:dy + H, :, :] * w[dy * K + dx]   # dy slice: free
            acc = term if acc is None else acc + term
    acc = acc + aff[0]                        # conv bias

    # ---- GELU -> folded eval-mode BatchNorm -> residual add ----------------
    # bf16 elementwise tail only where the VPU/EUP have a bf16 datapath
    # (v6e / v7x); always f32 on v5e and for f32 tensors.
    ew = jnp.bfloat16 if bf16_tail else jnp.float32
    g = _gelu_tanh(acc.astype(ew))
    y = g * aff[1].astype(ew) + aff[2].astype(ew)
    res = x_ref[...].astype(ew)               # residual straight from the resident block
    o_ref[...] = (y + res).astype(o_ref.dtype)


def _tpu_generation():
    """Best-effort TPU generation (4/5/6/7) from the device kind string."""
    try:
        kind = jax.devices()[0].device_kind.lower()
    except Exception:
        return 6
    if "7x" in kind or "v7" in kind:
        return 7
    if "v6" in kind:
        return 6
    if "v5" in kind:
        return 5
    if "v4" in kind:
        return 4
    return 6


def _block_vmem_bytes(H, W, ct, itemsize):
    """Per-grid-step VMEM estimate: double-buffered in/out blocks + f32 halo
    scratch + in-kernel f32 temporaries (hoisted slab, accumulator, tail)."""
    hp, wp = H + 2 * PAD, W + 2 * PAD
    pipeline = 2 * 2 * H * W * ct * itemsize      # in + out, double-buffered
    scratch = hp * wp * ct * 4                    # f32 halo scratch
    temps = 4 * hp * wp * ct * 4                  # col slab, acc, elementwise temps
    return pipeline + scratch + temps


def _pick_c_tile(C, B, H, W, itemsize, budget, want_steps):
    """Largest lane-aligned channel tile fitting the per-step VMEM budget, then
    (v7x) shrunk until there are enough grid steps to feed both TensorCores."""
    if C % 128 != 0:
        return C          # block must equal the full dim anyway
    ct = 128
    while (ct * 2 <= C and C % (ct * 2) == 0
           and _block_vmem_bytes(H, W, ct * 2, itemsize) <= budget):
        ct *= 2
    while B * (C // ct) < want_steps and ct >= 256:
        ct //= 2
    return ct


def residual_convmixer_block(x, w_oihw, bias, gamma, beta, run_mean, run_var):
    """Residual(depthwise Conv2d -> GELU -> BatchNorm2d)(x); x is NCHW."""
    B, C, H, W = x.shape
    gen = _tpu_generation()

    # ---- plain-JAX glue: layout + parameter folding (no HBM pre-padding) ----
    # NCHW -> NHWC (in a channels-last pipeline these transposes vanish).
    x_nhwc = jnp.transpose(x, (0, 2, 3, 1))
    # Depthwise weights (C, 1, K, K) -> (K*K, C): tap-major rows, channels on lanes.
    w_tap = jnp.transpose(w_oihw[:, 0, :, :].reshape(C, K * K), (1, 0))
    # Fold eval-mode BatchNorm into one scale/shift pair (no in-kernel rsqrt).
    scale = gamma * jax.lax.rsqrt(run_var + BN_EPS)
    shift = beta - run_mean * scale
    aff = jnp.stack([bias, scale, shift], axis=0).astype(jnp.float32)   # (3, C)

    itemsize = jnp.dtype(x.dtype).itemsize
    # Generation-dependent sizing: v7x has 64 MiB VMEM and 2 TCs; v5e/v6e have
    # 128 MiB VMEM and a single TC (bigger blocks = fewer per-step overheads).
    budget = (12 << 20) if gen >= 7 else (24 << 20)
    vmem_cap = (40 << 20) if gen >= 7 else (64 << 20)
    want_steps = 4 if gen >= 7 else 1
    c_tile = _pick_c_tile(C, B, H, W, itemsize, budget, want_steps)
    n_c = C // c_tile
    # TODO(synk): on v7x with B * n_c still < 2 (e.g. B=1, C<=128) an extra H
    # row-band grid axis (1-row halo per band) would be needed to feed both TCs.

    work = _block_vmem_bytes(H, W, c_tile, itemsize)
    params = 2 * (K * K + 3) * c_tile * 4
    vmem_limit = int(min(vmem_cap, max(work + params + (4 << 20), 16 << 20)))

    bf16_tail = (gen >= 6) and (jnp.dtype(x.dtype) == jnp.dtype(jnp.bfloat16))
    kernel = functools.partial(_residual_block_kernel, bf16_tail=bf16_tail)

    out_nhwc = pl.pallas_call(
        kernel,
        out_shape=jax.ShapeDtypeStruct((B, H, W, C), x.dtype),
        grid=(n_c, B),                        # batch innermost: params not re-DMA'd
        in_specs=[
            pl.BlockSpec((1, H, W, c_tile), lambda c, b: (b, 0, 0, c)),
            pl.BlockSpec((K * K, c_tile), lambda c, b: (0, c)),
            pl.BlockSpec((3, c_tile), lambda c, b: (0, c)),
        ],
        out_specs=pl.BlockSpec((1, H, W, c_tile), lambda c, b: (b, 0, 0, c)),
        scratch_shapes=[
            pltpu.VMEM((1, H + 2 * PAD, W + 2 * PAD, c_tile), jnp.float32),
        ],
        compiler_params=pltpu.CompilerParams(
            dimension_semantics=("parallel", "parallel"),
            vmem_limit_bytes=vmem_limit),
    )(x_nhwc, w_tap, aff)

    return jnp.transpose(out_nhwc, (0, 3, 1, 2))                        # NHWC -> NCHW


def _reference(x, w_oihw, bias, gamma, beta, run_mean, run_var):
    """Pure-JAX reference of the same forward pass (NCHW, f32)."""
    _, C, _, _ = x.shape
    y = jax.lax.conv_general_dilated(
        x, w_oihw, window_strides=(1, 1), padding="SAME",
        dimension_numbers=("NCHW", "OIHW", "NCHW"), feature_group_count=C)
    y = y + bias[None, :, None, None]
    y = _gelu_tanh(y)
    inv = jax.lax.rsqrt(run_var + BN_EPS)
    y = (y - run_mean[None, :, None, None]) * (gamma * inv)[None, :, None, None] \
        + beta[None, :, None, None]
    return y + x


if __name__ == "__main__":
    key = jax.random.PRNGKey(0)

    def make_inputs(B, C, H, W, dtype):
        kx, kw, kb = jax.random.split(jax.random.fold_in(key, B * 1000 + C), 3)
        x = jax.random.normal(kx, (B, C, H, W), dtype=jnp.float32).astype(dtype)
        w_oihw = 0.1 * jax.random.normal(kw, (C, 1, K, K), dtype=jnp.float32)
        bias = 0.1 * jax.random.normal(kb, (C,), dtype=jnp.float32)
        gamma = jnp.ones((C,), jnp.float32)
        beta = jnp.zeros((C,), jnp.float32)
        run_mean = jnp.zeros((C,), jnp.float32)
        run_var = jnp.ones((C,), jnp.float32)
        return x, w_oihw, bias, gamma, beta, run_mean, run_var

    # Case 1: module-sized small test (B=2, C=4, 16x16), f32.
    args = make_inputs(2, 4, 16, 16, jnp.float32)
    out = jax.block_until_ready(residual_convmixer_block(*args))
    ref = _reference(args[0].astype(jnp.float32), *args[1:])
    assert out.shape == (2, 4, 16, 16) and out.dtype == args[0].dtype
    assert jnp.allclose(out, ref, atol=1e-4, rtol=1e-4), "f32 small-case mismatch"

    # Case 2: 128-aligned channel-tiling path (still small), f32.
    args = make_inputs(1, 256, 8, 8, jnp.float32)
    out = jax.block_until_ready(residual_convmixer_block(*args))
    ref = _reference(args[0].astype(jnp.float32), *args[1:])
    assert jnp.allclose(out, ref, atol=1e-4, rtol=1e-4), "f32 tiled-case mismatch"

    # Case 3: bf16 tensor (bf16 elementwise tail on v6e/v7x, f32 tail on v5e).
    args = make_inputs(1, 256, 8, 8, jnp.bfloat16)
    out = jax.block_until_ready(residual_convmixer_block(*args))
    ref = _reference(args[0].astype(jnp.float32), *args[1:])
    assert out.dtype == jnp.bfloat16
    assert jnp.allclose(out.astype(jnp.float32), ref, atol=5e-2, rtol=5e-2), \
        "bf16 case mismatch"

    print("KERNEL_OK")
</pallas_src>

<mosaic_0001>
module attributes {stable_mosaic.version = 11 : i64} {
  func.func @_residual_block_kernel(%arg0: i32, %arg1: i32, %arg2: memref<1x16x16x4xf32, #tpu.memory_space<vmem>>, %arg3: memref<9x4xf32, #tpu.memory_space<vmem>>, %arg4: memref<3x4xf32, #tpu.memory_space<vmem>>, %arg5: memref<1x16x16x4xf32, #tpu.memory_space<vmem>>, %arg6: memref<1x18x18x4xf32, #tpu.memory_space<vmem>>) attributes {dimension_semantics = [#tpu.dimension_semantics<parallel>, #tpu.dimension_semantics<parallel>], iteration_bounds = array<i64: 1, 2>, scalar_prefetch = 0 : i64, scratch_operands = 1 : i64, tpu.core_type = #tpu.core_type<tc>, window_params = [{transform_indices = @transform_0, window_bounds = array<i64: 1, 16, 16, 4>}, {transform_indices = @transform_1, window_bounds = array<i64: 9, 4>}, {transform_indices = @transform_2, window_bounds = array<i64: 3, 4>}, {transform_indices = @transform_3, window_bounds = array<i64: 1, 16, 16, 4>}]} {
    %cst = arith.constant 0.000000e+00 : f32
    %0 = vector.broadcast %cst : f32 to vector<1x1x18x4xf32>
    %c0 = arith.constant 0 : index
    %c0_0 = arith.constant 0 : index
    %c0_1 = arith.constant 0 : index
    %c0_2 = arith.constant 0 : index
    %1 = vector.load %arg6[%c0, %c0_0, %c0_1, %c0_2] : memref<1x18x18x4xf32, #tpu.memory_space<vmem>>, vector<1x1x18x4xf32>
    tpu.vector_store %arg6[%c0, %c0_0, %c0_1, %c0_2], %0 {strides = array<i32>} : memref<1x18x18x4xf32, #tpu.memory_space<vmem>>, vector<1x1x18x4xf32>,
    %cst_3 = arith.constant 0.000000e+00 : f32
    %2 = vector.broadcast %cst_3 : f32 to vector<1x1x18x4xf32>
    %c0_4 = arith.constant 0 : index
    %c17 = arith.constant 17 : index
    %c0_5 = arith.constant 0 : index
    %c0_6 = arith.constant 0 : index
    %3 = vector.load %arg6[%c0_4, %c17, %c0_5, %c0_6] : memref<1x18x18x4xf32, #tpu.memory_space<vmem>>, vector<1x1x18x4xf32>
    tpu.vector_store %arg6[%c0_4, %c17, %c0_5, %c0_6], %2 {strides = array<i32>} : memref<1x18x18x4xf32, #tpu.memory_space<vmem>>, vector<1x1x18x4xf32>,
    %cst_7 = arith.constant 0.000000e+00 : f32
    %4 = vector.broadcast %cst_7 : f32 to vector<1x18x1x4xf32>
    %c0_8 = arith.constant 0 : index
    %c0_9 = arith.constant 0 : index
    %c0_10 = arith.constant 0 : index
    %c0_11 = arith.constant 0 : index
    %5 = vector.load %arg6[%c0_8, %c0_9, %c0_10, %c0_11] : memref<1x18x18x4xf32, #tpu.memory_space<vmem>>, vector<1x18x1x4xf32>
    tpu.vector_store %arg6[%c0_8, %c0_9, %c0_10, %c0_11], %4 {strides = array<i32>} : memref<1x18x18x4xf32, #tpu.memory_space<vmem>>, vector<1x18x1x4xf32>,
    %cst_12 = arith.constant 0.000000e+00 : f32
    %6 = vector.broadcast %cst_12 : f32 to vector<1x18x1x4xf32>
    %c0_13 = arith.constant 0 : index
    %c0_14 = arith.constant 0 : index
    %c17_15 = arith.constant 17 : index
    %c0_16 = arith.constant 0 : index
    %7 = vector.load %arg6[%c0_13, %c0_14, %c17_15, %c0_16] : memref<1x18x18x4xf32, #tpu.memory_space<vmem>>, vector<1x18x1x4xf32>
    tpu.vector_store %arg6[%c0_13, %c0_14, %c17_15, %c0_16], %6 {strides = array<i32>} : memref<1x18x18x4xf32, #tpu.memory_space<vmem>>, vector<1x18x1x4xf32>,
    %c0_17 = arith.constant 0 : index
    %c0_18 = arith.constant 0 : index
    %c0_19 = arith.constant 0 : index
    %c0_20 = arith.constant 0 : index
    %8 = vector.load %arg2[%c0_17, %c0_18, %c0_19, %c0_20] : memref<1x16x16x4xf32, #tpu.memory_space<vmem>>, vector<1x16x16x4xf32>
    %c0_21 = arith.constant 0 : index
    %c1 = arith.constant 1 : index
    %c1_22 = arith.constant 1 : index
    %c0_23 = arith.constant 0 : index
    %9 = vector.load %arg6[%c0_21, %c1, %c1_22, %c0_23] : memref<1x18x18x4xf32, #tpu.memory_space<vmem>>, vector<1x16x16x4xf32>
    tpu.vector_store %arg6[%c0_21, %c1, %c1_22, %c0_23], %8 {strides = array<i32>} : memref<1x18x18x4xf32, #tpu.memory_space<vmem>>, vector<1x16x16x4xf32>,
    %c0_24 = arith.constant 0 : index
    %c0_25 = arith.constant 0 : index
    %10 = vector.load %arg3[%c0_24, %c0_25] : memref<9x4xf32, #tpu.memory_space<vmem>>, vector<9x4xf32>
    %c0_26 = arith.constant 0 : index
    %c0_27 = arith.constant 0 : index
    %11 = vector.load %arg4[%c0_26, %c0_27] : memref<3x4xf32, #tpu.memory_space<vmem>>, vector<3x4xf32>
    %c0_28 = arith.constant 0 : index
    %c0_29 = arith.constant 0 : index
    %c0_30 = arith.constant 0 : index
    %c0_31 = arith.constant 0 : index
    %12 = vector.load %arg6[%c0_28, %c0_29, %c0_30, %c0_31] : memref<1x18x18x4xf32, #tpu.memory_space<vmem>>, vector<1x18x16x4xf32>
    %13 = vector.extract_strided_slice %12 {offsets = [0, 0, 0, 0], sizes = [1, 16, 16, 4], strides = [1, 1, 1, 1]} : vector<1x18x16x4xf32> to vector<1x16x16x4xf32>
    %14 = vector.extract_strided_slice %10 {offsets = [0, 0], sizes = [1, 4], strides = [1, 1]} : vector<9x4xf32> to vector<1x4xf32>
    %15 = vector.shape_cast %14 : vector<1x4xf32> to vector<4xf32>
    %16 = vector.shape_cast %15 : vector<4xf32> to vector<1x1x1x4xf32>
    %17 = vector.broadcast %16 : vector<1x1x1x4xf32> to vector<1x16x16x4xf32>
    %18 = arith.mulf %13, %17 : vector<1x16x16x4xf32>
    %19 = vector.extract_strided_slice %12 {offsets = [0, 1, 0, 0], sizes = [1, 16, 16, 4], strides = [1, 1, 1, 1]} : vector<1x18x16x4xf32> to vector<1x16x16x4xf32>
    %20 = vector.extract_strided_slice %10 {offsets = [3, 0], sizes = [1, 4], strides = [1, 1]} : vector<9x4xf32> to vector<1x4xf32>
    %21 = vector.shape_cast %20 : vector<1x4xf32> to vector<4xf32>
    %22 = vector.shape_cast %21 : vector<4xf32> to vector<1x1x1x4xf32>
    %23 = vector.broadcast %22 : vector<1x1x1x4xf32> to vector<1x16x16x4xf32>
    %24 = arith.mulf %19, %23 : vector<1x16x16x4xf32>
    %25 = arith.addf %18, %24 : vector<1x16x16x4xf32>
    %26 = vector.extract_strided_slice %12 {offsets = [0, 2, 0, 0], sizes = [1, 16, 16, 4], strides = [1, 1, 1, 1]} : vector<1x18x16x4xf32> to vector<1x16x16x4xf32>
    %27 = vector.extract_strided_slice %10 {offsets = [6, 0], sizes = [1, 4], strides = [1, 1]} : vector<9x4xf32> to vector<1x4xf32>
    %28 = vector.shape_cast %27 : vector<1x4xf32> to vector<4xf32>
    %29 = vector.shape_cast %28 : vector<4xf32> to vector<1x1x1x4xf32>
    %30 = vector.broadcast %29 : vector<1x1x1x4xf32> to vector<1x16x16x4xf32>
    %31 = arith.mulf %26, %30 : vector<1x16x16x4xf32>
    %32 = arith.addf %25, %31 : vector<1x16x16x4xf32>
    %c0_32 = arith.constant 0 : index
    %c0_33 = arith.constant 0 : index
    %c1_34 = arith.constant 1 : index
    %c0_35 = arith.constant 0 : index
    %33 = vector.load %arg6[%c0_32, %c0_33, %c1_34, %c0_35] : memref<1x18x18x4xf32, #tpu.memory_space<vmem>>, vector<1x18x16x4xf32>
    %34 = vector.extract_strided_slice %33 {offsets = [0, 0, 0, 0], sizes = [1, 16, 16, 4], strides = [1, 1, 1, 1]} : vector<1x18x16x4xf32> to vector<1x16x16x4xf32>
    %35 = vector.extract_strided_slice %10 {offsets = [1, 0], sizes = [1, 4], strides = [1, 1]} : vector<9x4xf32> to vector<1x4xf32>
    %36 = vector.shape_cast %35 : vector<1x4xf32> to vector<4xf32>
    %37 = vector.shape_cast %36 : vector<4xf32> to vector<1x1x1x4xf32>
    %38 = vector.broadcast %37 : vector<1x1x1x4xf32> to vector<1x16x16x4xf32>
    %39 = arith.mulf %34, %38 : vector<1x16x16x4xf32>
    %40 = arith.addf %32, %39 : vector<1x16x16x4xf32>
    %41 = vector.extract_strided_slice %33 {offsets = [0, 1, 0, 0], sizes = [1, 16, 16, 4], strides = [1, 1, 1, 1]} : vector<1x18x16x4xf32> to vector<1x16x16x4xf32>
    %42 = vector.extract_strided_slice %10 {offsets = [4, 0], sizes = [1, 4], strides = [1, 1]} : vector<9x4xf32> to vector<1x4xf32>
    %43 = vector.shape_cast %42 : vector<1x4xf32> to vector<4xf32>
    %44 = vector.shape_cast %43 : vector<4xf32> to vector<1x1x1x4xf32>
    %45 = vector.broadcast %44 : vector<1x1x1x4xf32> to vector<1x16x16x4xf32>
    %46 = arith.mulf %41, %45 : vector<1x16x16x4xf32>
    %47 = arith.addf %40, %46 : vector<1x16x16x4xf32>
    %48 = vector.extract_strided_slice %33 {offsets = [0, 2, 0, 0], sizes = [1, 16, 16, 4], strides = [1, 1, 1, 1]} : vector<1x18x16x4xf32> to vector<1x16x16x4xf32>
    %49 = vector.extract_strided_slice %10 {offsets = [7, 0], sizes = [1, 4], strides = [1, 1]} : vector<9x4xf32> to vector<1x4xf32>
    %50 = vector.shape_cast %49 : vector<1x4xf32> to vector<4xf32>
    %51 = vector.shape_cast %50 : vector<4xf32> to vector<1x1x1x4xf32>
    %52 = vector.broadcast %51 : vector<1x1x1x4xf32> to vector<1x16x16x4xf32>
    %53 = arith.mulf %48, %52 : vector<1x16x16x4xf32>
    %54 = arith.addf %47, %53 : vector<1x16x16x4xf32>
    %c0_36 = arith.constant 0 : index
    %c0_37 = arith.constant 0 : index
    %c2 = arith.constant 2 : index
    %c0_38 = arith.constant 0 : index
    %55 = vector.load %arg6[%c0_36, %c0_37, %c2, %c0_38] : memref<1x18x18x4xf32, #tpu.memory_space<vmem>>, vector<1x18x16x4xf32>
    %56 = vector.extract_strided_slice %55 {offsets = [0, 0, 0, 0], sizes = [1, 16, 16, 4], strides = [1, 1, 1, 1]} : vector<1x18x16x4xf32> to vector<1x16x16x4xf32>
    %57 = vector.extract_strided_slice %10 {offsets = [2, 0], sizes = [1, 4], strides = [1, 1]} : vector<9x4xf32> to vector<1x4xf32>
    %58 = vector.shape_cast %57 : vector<1x4xf32> to vector<4xf32>
    %59 = vector.shape_cast %58 : vector<4xf32> to vector<1x1x1x4xf32>
    %60 = vector.broadcast %59 : vector<1x1x1x4xf32> to vector<1x16x16x4xf32>
    %61 = arith.mulf %56, %60 : vector<1x16x16x4xf32>
    %62 = arith.addf %54, %61 : vector<1x16x16x4xf32>
    %63 = vector.extract_strided_slice %55 {offsets = [0, 1, 0, 0], sizes = [1, 16, 16, 4], strides = [1, 1, 1, 1]} : vector<1x18x16x4xf32> to vector<1x16x16x4xf32>
    %64 = vector.extract_strided_slice %10 {offsets = [5, 0], sizes = [1, 4], strides = [1, 1]} : vector<9x4xf32> to vector<1x4xf32>
    %65 = vector.shape_cast %64 : vector<1x4xf32> to vector<4xf32>
    %66 = vector.shape_cast %65 : vector<4xf32> to vector<1x1x1x4xf32>
    %67 = vector.broadcast %66 : vector<1x1x1x4xf32> to vector<1x16x16x4xf32>
    %68 = arith.mulf %63, %67 : vector<1x16x16x4xf32>
    %69 = arith.addf %62, %68 : vector<1x16x16x4xf32>
    %70 = vector.extract_strided_slice %55 {offsets = [0, 2, 0, 0], sizes = [1, 16, 16, 4], strides = [1, 1, 1, 1]} : vector<1x18x16x4xf32> to vector<1x16x16x4xf32>
    %71 = vector.extract_strided_slice %10 {offsets = [8, 0], sizes = [1, 4], strides = [1, 1]} : vector<9x4xf32> to vector<1x4xf32>
    %72 = vector.shape_cast %71 : vector<1x4xf32> to vector<4xf32>
    %73 = vector.shape_cast %72 : vector<4xf32> to vector<1x1x1x4xf32>
    %74 = vector.broadcast %73 : vector<1x1x1x4xf32> to vector<1x16x16x4xf32>
    %75 = arith.mulf %70, %74 : vector<1x16x16x4xf32>
    %76 = arith.addf %69, %75 : vector<1x16x16x4xf32>
    %77 = vector.extract_strided_slice %11 {offsets = [0, 0], sizes = [1, 4], strides = [1, 1]} : vector<3x4xf32> to vector<1x4xf32>
    %78 = vector.shape_cast %77 : vector<1x4xf32> to vector<4xf32>
    %79 = vector.shape_cast %78 : vector<4xf32> to vector<1x1x1x4xf32>
    %80 = vector.broadcast %79 : vector<1x1x1x4xf32> to vector<1x16x16x4xf32>
    %81 = arith.addf %76, %80 : vector<1x16x16x4xf32>
    %cst_39 = arith.constant 5.000000e-01 : f32
    %82 = vector.broadcast %cst_39 : f32 to vector<1x16x16x4xf32>
    %83 = arith.mulf %82, %81 : vector<1x16x16x4xf32>
    %cst_40 = arith.constant 4.471500e-02 : f32
    %84 = vector.broadcast %cst_40 : f32 to vector<1x16x16x4xf32>
    %85 = arith.mulf %84, %81 : vector<1x16x16x4xf32>
    %86 = arith.mulf %85, %81 : vector<1x16x16x4xf32>
    %87 = arith.mulf %86, %81 : vector<1x16x16x4xf32>
    %88 = arith.addf %81, %87 : vector<1x16x16x4xf32>
    %cst_41 = arith.constant 0.797884583 : f32
    %89 = vector.broadcast %cst_41 : f32 to vector<1x16x16x4xf32>
    %90 = arith.mulf %89, %88 : vector<1x16x16x4xf32>
    %91 = math.tanh %90 : vector<1x16x16x4xf32>
    %cst_42 = arith.constant 1.000000e+00 : f32
    %92 = vector.broadcast %cst_42 : f32 to vector<1x16x16x4xf32>
    %93 = arith.addf %92, %91 : vector<1x16x16x4xf32>
    %94 = arith.mulf %83, %93 : vector<1x16x16x4xf32>
    %95 = vector.extract_strided_slice %11 {offsets = [1, 0], sizes = [1, 4], strides = [1, 1]} : vector<3x4xf32> to vector<1x4xf32>
    %96 = vector.shape_cast %95 : vector<1x4xf32> to vector<4xf32>
    %97 = vector.shape_cast %96 : vector<4xf32> to vector<1x1x1x4xf32>
    %98 = vector.broadcast %97 : vector<1x1x1x4xf32> to vector<1x16x16x4xf32>
    %99 = arith.mulf %94, %98 : vector<1x16x16x4xf32>
    %100 = vector.extract_strided_slice %11 {offsets = [2, 0], sizes = [1, 4], strides = [1, 1]} : vector<3x4xf32> to vector<1x4xf32>
    %101 = vector.shape_cast %100 : vector<1x4xf32> to vector<4xf32>
    %102 = vector.shape_cast %101 : vector<4xf32> to vector<1x1x1x4xf32>
    %103 = vector.broadcast %102 : vector<1x1x1x4xf32> to vector<1x16x16x4xf32>
    %104 = arith.addf %99, %103 : vector<1x16x16x4xf32>
    %c0_43 = arith.constant 0 : index
    %c0_44 = arith.constant 0 : index
    %c0_45 = arith.constant 0 : index
    %c0_46 = arith.constant 0 : index
    %105 = vector.load %arg2[%c0_43, %c0_44, %c0_45, %c0_46] : memref<1x16x16x4xf32, #tpu.memory_space<vmem>>, vector<1x16x16x4xf32>
    %106 = arith.addf %104, %105 : vector<1x16x16x4xf32>
    %c0_47 = arith.constant 0 : index
    %c0_48 = arith.constant 0 : index
    %c0_49 = arith.constant 0 : index
    %c0_50 = arith.constant 0 : index
    %107 = vector.load %arg5[%c0_47, %c0_48, %c0_49, %c0_50] : memref<1x16x16x4xf32, #tpu.memory_space<vmem>>, vector<1x16x16x4xf32>
    tpu.vector_store %arg5[%c0_47, %c0_48, %c0_49, %c0_50], %106 {strides = array<i32>} : memref<1x16x16x4xf32, #tpu.memory_space<vmem>>, vector<1x16x16x4xf32>,
    return
  }
  func.func @transform_0(%arg0: i32, %arg1: i32) -> (i32, i32, i32, i32) {
    %c0_i32 = arith.constant 0 : i32
    %c0_i32_0 = arith.constant 0 : i32
    %c0_i32_1 = arith.constant 0 : i32
    return %arg1, %c0_i32, %c0_i32_0, %arg0 : i32, i32, i32, i32
  }
  func.func @transform_1(%arg0: i32, %arg1: i32) -> (i32, i32) {
    %c0_i32 = arith.constant 0 : i32
    %c0_i32_0 = arith.constant 0 : i32
    return %c0_i32, %arg0 : i32, i32
  }
  func.func @transform_2(%arg0: i32, %arg1: i32) -> (i32, i32) {
    %c0_i32 = arith.constant 0 : i32
    %c0_i32_0 = arith.constant 0 : i32
    return %c0_i32, %arg0 : i32, i32
  }
  func.func @transform_3(%arg0: i32, %arg1: i32) -> (i32, i32, i32, i32) {
    %c0_i32 = arith.constant 0 : i32
    %c0_i32_0 = arith.constant 0 : i32
    %c0_i32_1 = arith.constant 0 : i32
    return %arg1, %c0_i32, %c0_i32_0, %arg0 : i32, i32, i32, i32
  }
}

</mosaic_0001>

<bundles_post_ra>
// kernel: tpu_custom_call.1
= control target key start
LH: loop header
LB: loop body
LE: loop exit
PB: predicated region body
PF: predicated region fallthrough
CT: control target
= control target key end

     0   :  { %s1798_s12 = smov 0   ;;  %s1800_s13 = smov 0   ;;  %s3144_s0 = inlined_call_operand.vmem [shape: f32[2,16,16,4], index: 0, kind: input, shape index: {}]   ;;  %s3145_s1 = inlined_call_operand.vmem [shape: f32[9,4], index: 1, kind: input, shape index: {}]   ;;  %s3146_s2 = inlined_call_operand.vmem [shape: f32[3,4], index: 2, kind: input, shape index: {}]   ;;  %s3147_s3 = inlined_call_operand.vmem [shape: f32[2,16,16,4], index: 3, kind: output, shape index: {}]  }
   0x1   :  { %s1802_s14 = smov 0  }
   0x2 LB: > { %s22_s15 = sadd.s32 1, %s1771_s13  ;;  %p1650_p0 = scmp.ge.s32.totalorder %s1775_s14, 1  ;;  %s1775_s14 = sphi %s1802_s14, %s13_s14   ;;  %s1771_s13 = sphi %s1800_s13, %s3356_s13   ;;  %s1767_s12 = sphi %s1798_s12, %s3355_s12  }
   0x3   : > { %p23_p1 = scmp.ge.s32.totalorder %s22_s15, 2  ;;  %p174_p2 = scmp.lt.s32.totalorder %s1775_s14, 3 }
   0x5   : > { %s3358_s15 = smov (%p23_p1, %s22_s15), 0  ;;  %p175_p3 = pnand %p1650_p0, %p174_p2 }
   0x7   : > { %178 = sbr.rel (%p175_p3) target bundleno = 320 (0x140), region = 32 }
   0xe   : > { %vm236_vm0 = vcmask 31744   ;;  %v386_v0 = vlaneseq  ;;  %vm239_vm1 = vcmask 25600   ;;  %p212_p4 = scmp.lt.s32.totalorder %s1767_s12, 1  ;;  %v1777_v1 = vmov 0.0   ;;  %v347_v3 = vld [vmem:[%s3145_s1] sm:$0xff] }
   0xf   : > { %237 = vst.msk [vmem:[#allocation2] sm:$0xff] %vm236_vm0, %v1777_v1  ;;  %238 = vst.msk [vmem:[#allocation2 + $0x8] sm:$0xff] %vm236_vm0, %v1777_v1  ;;  %vm245_vm2 = vcmask 24576   ;;  %v349_v20 = vld [vmem:[%s3146_s2] sm:$0x7] }
  0x10   : > { %242 = vst.msk [vmem:[#allocation2 + $0x198] sm:$0xff] %vm236_vm0, %v1777_v1  ;;  %243 = vst.msk [vmem:[#allocation2 + $0x1a0] sm:$0xff] %vm236_vm0, %v1777_v1  ;;  %v1823_v2 = vshrl.u32 %v386_v0, 7  ;;  %s3360_s12 = smov (!%p212_p4, %s1767_s12), 1 }
  0x11   : > { %240 = vst.msk [vmem:[#allocation2 + $0x10] sm:$0x3] %vm239_vm1, %v1777_v1  ;;  %244 = vst.msk [vmem:[#allocation2 + $0x1a8] sm:$0x3] %vm239_vm1, %v1777_v1  ;;  %s1658_s16 = sshll.u32 %s3360_s12, 8 }
  0x12   : > { %246 = vst.msk [vmem:[#allocation2] sm:$0x1] %vm245_vm2, %v1777_v1  ;;  %247 = vst.msk [vmem:[#allocation2 + $0x18] sm:$0x1] %vm245_vm2, %v1777_v1  ;;  %v388_v4 = vsub.s32 0, %v1823_v2  ;;  %s1876_s21 = scalar_lea.vmem %s3144_s0, %s1658_s16  ;;  %v596_v5 = vsub.s32 1, %v1823_v2  ;;  %s2598_s28 = scalar_lea.vmem %s3147_s3, %s1658_s16 }
  0x13   : > { %248 = vst.msk [vmem:[#allocation2 + $0x30] sm:$0x1] %vm245_vm2, %v1777_v1  ;;  %249 = vst.msk [vmem:[#allocation2 + $0x48] sm:$0x1] %vm245_vm2, %v1777_v1  ;;  %v1880_v6 = vld [vmem:[%s1876_s21] sm:$0xff]  ;;  %v1883_v7 = vld [vmem:[%s1876_s21 + $0x8] sm:$0xff] }
  0x14   : > { %250 = vst.msk [vmem:[#allocation2 + $0x60] sm:$0x1] %vm245_vm2, %v1777_v1  ;;  %251 = vst.msk [vmem:[#allocation2 + $0x78] sm:$0x1] %vm245_vm2, %v1777_v1  ;;  %v1886_v8 = vld [vmem:[%s1876_s21 + $0x10] sm:$0xff]  ;;  %v424_v9 = vsub.s32 3, %v1823_v2  ;;  %v1913_v17 = vrot.slane %v347_v3, %v388_v4  ;;  %v1920_v24 = vrot.slane %v347_v3, %v596_v5  ;;  %v1954_v45 = vrot.slane %v349_v20, %v388_v4 }
  0x15   : > { %252 = vst.msk [vmem:[#allocation2 + $0x90] sm:$0x1] %vm245_vm2, %v1777_v1  ;;  %253 = vst.msk [vmem:[#allocation2 + $0xa8] sm:$0x1] %vm245_vm2, %v1777_v1  ;;  %v732_v10 = vsub.s32 7, %v1823_v2  ;;  %v1897_v11 = vld [vmem:[%s1876_s21 + $0x18] sm:$0xff]  ;;  %v1963_v51 = vrot.slane %v349_v20, %v596_v5 }
  0x16   : > { %254 = vst.msk [vmem:[#allocation2 + $0xc0] sm:$0x1] %vm245_vm2, %v1777_v1  ;;  %255 = vst.msk [vmem:[#allocation2 + $0xd8] sm:$0x1] %vm245_vm2, %v1777_v1  ;;  %v1900_v12 = vld [vmem:[%s1876_s21 + $0x20] sm:$0xff]  ;;  %v1903_v13 = vld [vmem:[%s1876_s21 + $0x28] sm:$0xff]  ;;  %v1922_v30 = vrot.slane %v347_v3, %v424_v9 }
  0x17   : > { %256 = vst.msk [vmem:[#allocation2 + $0xf0] sm:$0x1] %vm245_vm2, %v1777_v1  ;;  %257 = vst.msk [vmem:[#allocation2 + $0x108] sm:$0x1] %vm245_vm2, %v1777_v1  ;;  %v492_v14 = vsub.s32 6, %v1823_v2  ;;  %v836_v15 = vsub.s32 2, %v1823_v2  ;;  %v1924_v31 = vrot.slane %v347_v3, %v732_v10 }
  0x18   : > { %258 = vst.msk [vmem:[#allocation2 + $0x120] sm:$0x1] %vm245_vm2, %v1777_v1  ;;  %259 = vst.msk [vmem:[#allocation2 + $0x138] sm:$0x1] %vm245_vm2, %v1777_v1  ;;  %v351_v16 = vld [vmem:[#allocation2 + $0x8] sm:$0xff]  ;;  %v664_v19 = vsub.s32 4, %v1823_v2 }
  0x19   : > { %260 = vst.msk [vmem:[#allocation2 + $0x150] sm:$0x1] %vm245_vm2, %v1777_v1  ;;  %261 = vst.msk [vmem:[#allocation2 + $0x168] sm:$0x1] %vm245_vm2, %v1777_v1  ;;  %v558_v18 = vld [vmem:[#allocation2 + $0x1] sm:$0xff]  ;;  %v904_v21 = vsub.s32 5, %v1823_v2  ;;  %v1932_v34 = vrot.slane %v347_v3, %v492_v14  ;;  %v1941_v38 = vrot.slane %v347_v3, %v836_v15  ;;  %v391_v46 = vmul.f32 %v1913_v17, %v351_v16 }
  0x1a   : > { %262 = vst.msk [vmem:[#allocation2 + $0x180] sm:$0x1] %vm245_vm2, %v1777_v1  ;;  %263 = vst.msk [vmem:[#allocation2 + $0x198] sm:$0x1] %vm245_vm2, %v1777_v1  ;;  %v385_v22 = vld [vmem:[#allocation2 + $0x1a0] sm:$0xff]  ;;  %v559_v25 = vld [vmem:[#allocation2 + $0x9] sm:$0xff]  ;;  %v1944_v40 = vrot.slane %v347_v3, %v664_v19  ;;  %v1958_v47 = vmul.f32 %v1920_v24, %v558_v18  ;;  %v1965_v52 = vrot.slane %v349_v20, %v836_v15 }
  0x1b   : > { %264 = vst.msk [vmem:[#allocation2 + $0x11] sm:$0x1] %vm245_vm2, %v1777_v1  ;;  %265 = vst.msk [vmem:[#allocation2 + $0x29] sm:$0x1] %vm245_vm2, %v1777_v1  ;;  %v592_v23 = vld [vmem:[#allocation2 + $0x199] sm:$0xff]  ;;  %v798_v27 = vld [vmem:[#allocation2 + $0x2] sm:$0xff]  ;;  %v1952_v44 = vrot.slane %v347_v3, %v904_v21  ;;  %v1968_v53 = vmul.f32 %v1920_v24, %v559_v25  ;;  %v1972_v58 = vmul.f32 %v1932_v34, %v385_v22 }
  0x1c   : > { %266 = vst.msk [vmem:[#allocation2 + $0x41] sm:$0x1] %vm245_vm2, %v1777_v1  ;;  %267 = vst.msk [vmem:[#allocation2 + $0x59] sm:$0x1] %vm245_vm2, %v1777_v1  ;;  %v350_v26 = vld [vmem:[#allocation2] sm:$0xff]  ;;  %v1927_v32 = vld [vmem:[%s1876_s21 + $0x30] sm:$0xff]  ;;  %v1975_v59 = vmul.f32 %v1924_v31, %v592_v23  ;;  %v1985_v0 = vmul.f32 %v1941_v38, %v798_v27 }
  0x1d   : > { %268 = vst.msk [vmem:[#allocation2 + $0x71] sm:$0x1] %vm245_vm2, %v1777_v1  ;;  %269 = vst.msk [vmem:[#allocation2 + $0x89] sm:$0x1] %vm245_vm2, %v1777_v1  ;;  %v593_v29 = vld [vmem:[#allocation2 + $0x1a1] sm:$0xff]  ;;  %v1930_v33 = vld [vmem:[%s1876_s21 + $0x38] sm:$0xff]  ;;  %v390_v39 = vmul.f32 %v1913_v17, %v350_v26 }
  0x1e   : > { %270 = vst.msk [vmem:[#allocation2 + $0xa1] sm:$0x1] %vm245_vm2, %v1777_v1  ;;  %271 = vst.msk [vmem:[#allocation2 + $0xb9] sm:$0x1] %vm245_vm2, %v1777_v1  ;;  %v290_v35 = vld [vmem:[%s1876_s21 + $0x40] sm:$0xff]  ;;  %v291_v36 = vld [vmem:[%s1876_s21 + $0x48] sm:$0xff]  ;;  %v1982_v62 = vmul.f32 %v1924_v31, %v593_v29 }
  0x1f   : > { %272 = vst.msk [vmem:[#allocation2 + $0xd1] sm:$0x1] %vm245_vm2, %v1777_v1  ;;  %273 = vst.msk [vmem:[#allocation2 + $0xe9] sm:$0x1] %vm245_vm2, %v1777_v1  ;;  %v292_v37 = vld [vmem:[%s1876_s21 + $0x50] sm:$0xff]  ;;  %v293_v41 = vld [vmem:[%s1876_s21 + $0x58] sm:$0xff] }
  0x20   : > { %274 = vst.msk [vmem:[#allocation2 + $0x101] sm:$0x1] %vm245_vm2, %v1777_v1  ;;  %275 = vst.msk [vmem:[#allocation2 + $0x119] sm:$0x1] %vm245_vm2, %v1777_v1  ;;  %v294_v42 = vld [vmem:[%s1876_s21 + $0x60] sm:$0xff]  ;;  %v295_v43 = vld [vmem:[%s1876_s21 + $0x68] sm:$0xff] }
  0x21   : > { %276 = vst.msk [vmem:[#allocation2 + $0x131] sm:$0x1] %vm245_vm2, %v1777_v1  ;;  %277 = vst.msk [vmem:[#allocation2 + $0x149] sm:$0x1] %vm245_vm2, %v1777_v1  ;;  %v384_v28 = vld [vmem:[#allocation2 + $0x198] sm:$0xff]  ;;  %v296_v18 = vld [vmem:[%s1876_s21 + $0x70] sm:$0xff] }
  0x22   : > { %278 = vst.msk [vmem:[#allocation2 + $0x161] sm:$0x1] %vm245_vm2, %v1777_v1  ;;  %279 = vst.msk [vmem:[#allocation2 + $0x179] sm:$0x1] %vm245_vm2, %v1777_v1  ;;  %v799_v48 = vld [vmem:[#allocation2 + $0xa] sm:$0xff]  ;;  %v1979_v61 = vmul.f32 %v1932_v34, %v384_v28  ;;  %v297_v19 = vld [vmem:[%s1876_s21 + $0x78] sm:$0xff] }
  0x23   : > { %280 = vst.msk [vmem:[#allocation2 + $0x191] sm:$0x1] %vm245_vm2, %v1777_v1  ;;  %281 = vst.msk [vmem:[#allocation2 + $0x1a9] sm:$0x1] %vm245_vm2, %v1777_v1  ;;  %v1990_v9 = vmul.f32 %v1941_v38, %v799_v48  ;;  %v298_v20 = vld [vmem:[%s1876_s21 + $0x80] sm:$0xff] }
  0x24   : > { %3161 = vst [vmem:[#allocation3_spill] sm:$0xff] %v1880_v6  ;;  %3162 = vst [vmem:[#allocation4_spill] sm:$0xff] %v1883_v7 }
  0x25   : > { %3163 = vst [vmem:[#allocation5_spill] sm:$0xff] %v1886_v8  ;;  %315 = vst.msk [vmem:[#allocation2 + $0x19] sm:$0xff] %vm236_vm0, %v1880_v6 }
  0x26   : > { %316 = vst.msk [vmem:[#allocation2 + $0x21] sm:$0xff] %vm236_vm0, %v1883_v7  ;;  %317 = vst.msk [vmem:[#allocation2 + $0x31] sm:$0xff] %vm236_vm0, %v1886_v8  ;;  %v308_v8 = vld [vmem:[%s1876_s21 + $0xd0] sm:$0xff]  ;;  %v309_v7 = vld [vmem:[%s1876_s21 + $0xd8] sm:$0xff] }
  0x27   : > { %3164 = vst [vmem:[#allocation6_spill] sm:$0xff] %v1897_v11  ;;  %3165 = vst [vmem:[#allocation7_spill] sm:$0xff] %v1900_v12 }
  0x28   : > { %3166 = vst [vmem:[#allocation8_spill] sm:$0xff] %v1903_v13  ;;  %318 = vst.msk [vmem:[#allocation2 + $0x39] sm:$0xff] %vm236_vm0, %v1897_v11 }
  0x29   : > { %319 = vst.msk [vmem:[#allocation2 + $0x49] sm:$0xff] %vm236_vm0, %v1900_v12  ;;  %320 = vst.msk [vmem:[#allocation2 + $0x51] sm:$0xff] %vm236_vm0, %v1903_v13  ;;  %v306_v13 = vld [vmem:[%s1876_s21 + $0xc0] sm:$0xff] }
  0x2a   : > { %3167 = vst [vmem:[#allocation9_spill] sm:$0xff] %v1920_v24  ;;  %3168 = vst [vmem:[#allocation10_spill] sm:$0xff] %v1927_v32 }
  0x2b   : > { %3169 = vst [vmem:[#allocation11_spill] sm:$0xff] %v1930_v33  ;;  %321 = vst.msk [vmem:[#allocation2 + $0x61] sm:$0xff] %vm236_vm0, %v1927_v32 }
  0x2c   : > { %322 = vst.msk [vmem:[#allocation2 + $0x69] sm:$0xff] %vm236_vm0, %v1930_v33  ;;  %3170 = vst [vmem:[#allocation12_spill] sm:$0xff] %v1944_v40  ;;  %v352_v49 = vld [vmem:[#allocation2 + $0x18] sm:$0xff] }
  0x2d   : > { %323 = vst.msk [vmem:[#allocation2 + $0x79] sm:$0xff] %vm236_vm0, %v290_v35  ;;  %324 = vst.msk [vmem:[#allocation2 + $0x81] sm:$0xff] %vm236_vm0, %v291_v36  ;;  %v353_v50 = vld [vmem:[#allocation2 + $0x20] sm:$0xff]  ;;  %v426_v54 = vmul.f32 %v1922_v30, %v352_v49  ;;  %v354_v57 = vld [vmem:[#allocation2 + $0x30] sm:$0xff]  ;;  %v392_v1 = vmul.f32 %v1913_v17, %v352_v49 }
  0x2e   : > { %325 = vst.msk [vmem:[#allocation2 + $0x91] sm:$0xff] %vm236_vm0, %v292_v37  ;;  %326 = vst.msk [vmem:[#allocation2 + $0x99] sm:$0xff] %vm236_vm0, %v293_v41  ;;  %v560_v55 = vld [vmem:[#allocation2 + $0x19] sm:$0xff]  ;;  %v561_v56 = vld [vmem:[#allocation2 + $0x21] sm:$0xff]  ;;  %v427_v60 = vmul.f32 %v1922_v30, %v353_v50  ;;  %v428_v3 = vmul.f32 %v1922_v30, %v354_v57  ;;  %v393_v15 = vmul.f32 %v1913_v17, %v353_v50 }
  0x2f   : > { %327 = vst.msk [vmem:[#allocation2 + $0xa9] sm:$0xff] %vm236_vm0, %v294_v42  ;;  %328 = vst.msk [vmem:[#allocation2 + $0xb1] sm:$0xff] %vm236_vm0, %v295_v43  ;;  %v355_v63 = vld [vmem:[#allocation2 + $0x38] sm:$0xff]  ;;  %v458_v2 = vadd.f32 %v426_v54, %v390_v39  ;;  %v1993_v10 = vmul.f32 %v1920_v24, %v560_v55  ;;  %v1996_v14 = vmul.f32 %v1944_v40, %v560_v55 }
  0x30   : > { %3171 = vst [vmem:[#allocation13_spill] sm:$0xff] %v1963_v51  ;;  %3172 = vst [vmem:[#allocation14_spill] sm:$0xff] %v1965_v52  ;;  %v562_v4 = vld [vmem:[#allocation2 + $0x31] sm:$0xff]  ;;  %v356_v5 = vld [vmem:[#allocation2 + $0x48] sm:$0xff]  ;;  %v2000_v16 = vmul.f32 %v1920_v24, %v561_v56  ;;  %v2006_v21 = vmul.f32 %v1944_v40, %v561_v56  ;;  %v394_v22 = vmul.f32 %v1913_v17, %v354_v57 }
  0x31   : > { %3173 = vst [vmem:[#allocation15_spill] sm:$0xff] %v1972_v58  ;;  %3174 = vst [vmem:[#allocation16_spill] sm:$0xff] %v1975_v59  ;;  %v494_v23 = vmul.f32 %v1932_v34, %v354_v57  ;;  %v429_v25 = vmul.f32 %v1922_v30, %v355_v63  ;;  %v563_v26 = vld [vmem:[#allocation2 + $0x39] sm:$0xff]  ;;  %v459_v27 = vadd.f32 %v427_v60, %v391_v46  ;;  %v357_v36 = vld [vmem:[#allocation2 + $0x50] sm:$0xff] }
  0x32   : > { %3175 = vst [vmem:[#allocation17_spill] sm:$0xff] %v1982_v62  ;;  %329 = vst.msk [vmem:[#allocation2 + $0xc1] sm:$0xff] %vm236_vm0, %v296_v18  ;;  %v2015_v28 = vmul.f32 %v1920_v24, %v562_v4  ;;  %v2018_v29 = vmul.f32 %v1944_v40, %v562_v4  ;;  %v2021_v35 = vmul.f32 %v1924_v31, %v562_v4  ;;  %v564_v43 = vld [vmem:[#allocation2 + $0x49] sm:$0xff]  ;;  %v358_v54 = vld [vmem:[#allocation2 + $0x60] sm:$0xff] }
  0x33   : > { %330 = vst.msk [vmem:[#allocation2 + $0xc9] sm:$0xff] %vm236_vm0, %v297_v19  ;;  %331 = vst.msk [vmem:[#allocation2 + $0xd9] sm:$0xff] %vm236_vm0, %v298_v20  ;;  %v460_v37 = vadd.f32 %v428_v3, %v392_v1  ;;  %v2023_v39 = vadd.f32 %v494_v23, %v458_v2  ;;  %v395_v41 = vmul.f32 %v1913_v17, %v355_v63  ;;  %v566_v1 = vld [vmem:[#allocation2 + $0x61] sm:$0xff]  ;;  %v300_v19 = vld [vmem:[%s1876_s21 + $0x90] sm:$0xff] }
  0x34   : > { %v430_v42 = vmul.f32 %v1922_v30, %v356_v5  ;;  %v495_v46 = vmul.f32 %v1932_v34, %v355_v63  ;;  %v2029_v48 = vmul.f32 %v1920_v24, %v563_v26  ;;  %v2032_v49 = vmul.f32 %v1944_v40, %v563_v26  ;;  %v565_v63 = vld [vmem:[#allocation2 + $0x51] sm:$0xff]  ;;  %v359_v18 = vld [vmem:[#allocation2 + $0x68] sm:$0xff]  ;;  %333 = vst.msk [vmem:[#allocation2 + $0xf1] sm:$0xff] %vm236_vm0, %v300_v19  ;;  %v361_v33 = vld [vmem:[#allocation2 + $0x80] sm:$0xff] }
  0x35   : > { %v2035_v50 = vmul.f32 %v1924_v31, %v563_v26  ;;  %v461_v55 = vadd.f32 %v429_v25, %v393_v15  ;;  %v396_v56 = vmul.f32 %v1913_v17, %v356_v5  ;;  %v496_v57 = vmul.f32 %v1932_v34, %v356_v5  ;;  %v299_v5 = vld [vmem:[%s1876_s21 + $0x88] sm:$0xff]  ;;  %339 = vst.msk [vmem:[#allocation2 + $0x139] sm:$0xff] %vm236_vm0, %v306_v13  ;;  %v310_v13 = vld [vmem:[%s1876_s21 + $0xe0] sm:$0xff] }
  0x36   : > { %v431_v60 = vmul.f32 %v1922_v30, %v357_v36  ;;  %v2040_v2 = vadd.f32 %v495_v46, %v459_v27  ;;  %v2043_v3 = vmul.f32 %v1920_v24, %v564_v43  ;;  %v2046_v4 = vmul.f32 %v1944_v40, %v564_v43  ;;  %332 = vst.msk [vmem:[#allocation2 + $0xe1] sm:$0xff] %vm236_vm0, %v299_v5  ;;  %v301_v27 = vld [vmem:[%s1876_s21 + $0x98] sm:$0xff]  ;;  %v302_v46 = vld [vmem:[%s1876_s21 + $0xa0] sm:$0xff]  ;;  %v303_v62 = vld [vmem:[%s1876_s21 + $0xa8] sm:$0xff] }
  0x37   : > { %v2049_v15 = vmul.f32 %v1924_v31, %v564_v43  ;;  %v462_v20 = vadd.f32 %v430_v42, %v394_v22  ;;  %v2053_v23 = vadd.f32 %v496_v57, %v460_v37  ;;  %v397_v25 = vmul.f32 %v1913_v17, %v357_v36  ;;  %v360_v42 = vld [vmem:[#allocation2 + $0x78] sm:$0xff]  ;;  %334 = vst.msk [vmem:[#allocation2 + $0xf9] sm:$0xff] %vm236_vm0, %v301_v27  ;;  %v567_v58 = vld [vmem:[#allocation2 + $0x69] sm:$0xff] }
  0x38   : > { %v432_v26 = vmul.f32 %v1922_v30, %v358_v54  ;;  %v497_v43 = vmul.f32 %v1932_v34, %v357_v36  ;;  %v2064_v59 = vmul.f32 %v1920_v24, %v565_v63  ;;  %v2067_v22 = vmul.f32 %v1944_v40, %v565_v63  ;;  %335 = vst.msk [vmem:[#allocation2 + $0x109] sm:$0xff] %vm236_vm0, %v302_v46  ;;  %v305_v46 = vld [vmem:[%s1876_s21 + $0xb8] sm:$0xff] }
  0x39   : > { %v2070_v37 = vmul.f32 %v1924_v31, %v565_v63  ;;  %336 = vst.msk [vmem:[#allocation2 + $0x111] sm:$0xff] %vm236_vm0, %v303_v62  ;;  %v463_v36 = vadd.f32 %v431_v60, %v395_v41  ;;  %v398_v57 = vmul.f32 %v1913_v17, %v358_v54  ;;  %v498_v5 = vmul.f32 %v1932_v34, %v358_v54  ;;  %v568_v63 = vld [vmem:[#allocation2 + $0x79] sm:$0xff]  ;;  %v362_v54 = vld [vmem:[#allocation2 + $0x90] sm:$0xff] }
  0x3a   : > { %3176 = vst [vmem:[#allocation18_spill] sm:$0xff] %v2064_v59  ;;  %v433_v19 = vmul.f32 %v1922_v30, %v359_v18  ;;  %v2078_v32 = vadd.f32 %v497_v43, %v461_v55  ;;  %v2081_v27 = vmul.f32 %v1920_v24, %v566_v1  ;;  %v2084_v62 = vmul.f32 %v1944_v40, %v566_v1  ;;  %v304_v60 = vld [vmem:[%s1876_s21 + $0xb0] sm:$0xff] }
  0x3b   : > { %v2087_v41 = vmul.f32 %v1924_v31, %v566_v1  ;;  %v464_v12 = vadd.f32 %v432_v26, %v396_v56  ;;  %v2092_v11 = vadd.f32 %v498_v5, %v462_v20  ;;  %v399_v55 = vmul.f32 %v1913_v17, %v359_v18  ;;  %337 = vst.msk [vmem:[#allocation2 + $0x121] sm:$0xff] %vm236_vm0, %v304_v60  ;;  %v307_v1 = vld [vmem:[%s1876_s21 + $0xc8] sm:$0xff] }
  0x3c   : > { %3177 = vst [vmem:[#allocation19_spill] sm:$0xff] %v2081_v27  ;;  %v434_v43 = vmul.f32 %v1922_v30, %v360_v42  ;;  %338 = vst.msk [vmem:[#allocation2 + $0x129] sm:$0xff] %vm236_vm0, %v305_v46  ;;  %v499_v56 = vmul.f32 %v1932_v34, %v359_v18  ;;  %v2104_v20 = vmul.f32 %v1920_v24, %v567_v58  ;;  %v311_v60 = vld [vmem:[%s1876_s21 + $0xe8] sm:$0xff]  ;;  %v312_v46 = vld [vmem:[%s1876_s21 + $0xf0] sm:$0xff] }
  0x3d   : > { %v2107_v26 = vmul.f32 %v1944_v40, %v567_v58  ;;  %v2110_v5 = vmul.f32 %v1924_v31, %v567_v58  ;;  %340 = vst.msk [vmem:[#allocation2 + $0x141] sm:$0xff] %vm236_vm0, %v307_v1  ;;  %341 = vst.msk [vmem:[#allocation2 + $0x151] sm:$0xff] %vm236_vm0, %v308_v8  ;;  %v465_v18 = vadd.f32 %v433_v19, %v397_v25  ;;  %v313_v8 = vld [vmem:[%s1876_s21 + $0xf8] sm:$0xff]  ;;  %v572_v59 = vld [vmem:[#allocation2 + $0xa9] sm:$0xff] }
  0x3e   : > { %3178 = vst [vmem:[#allocation20_spill] sm:$0xff] %v2104_v20  ;;  %342 = vst.msk [vmem:[#allocation2 + $0x159] sm:$0xff] %vm236_vm0, %v309_v7  ;;  %v400_v6 = vmul.f32 %v1913_v17, %v360_v42  ;;  %v500_v52 = vmul.f32 %v1932_v34, %v360_v42  ;;  %v435_v51 = vmul.f32 %v1922_v30, %v361_v33  ;;  %v569_v20 = vld [vmem:[#allocation2 + $0x81] sm:$0xff]  ;;  %v363_v19 = vld [vmem:[#allocation2 + $0x98] sm:$0xff] }
  0x3f   : > { %3179 = vst [vmem:[#allocation21_spill] sm:$0xff] %v2107_v26  ;;  %343 = vst.msk [vmem:[#allocation2 + $0x169] sm:$0xff] %vm236_vm0, %v310_v13  ;;  %v2125_v58 = vadd.f32 %v499_v56, %v463_v36  ;;  %v2128_v7 = vmul.f32 %v1920_v24, %v568_v63  ;;  %v2131_v25 = vmul.f32 %v1944_v40, %v568_v63  ;;  %v570_v56 = vld [vmem:[#allocation2 + $0x91] sm:$0xff]  ;;  %v571_v27 = vld [vmem:[#allocation2 + $0x99] sm:$0xff] }
  0x40   : > { %344 = vst.msk [vmem:[#allocation2 + $0x171] sm:$0xff] %vm236_vm0, %v311_v60  ;;  %345 = vst.msk [vmem:[#allocation2 + $0x181] sm:$0xff] %vm236_vm0, %v312_v46  ;;  %v2134_v42 = vmul.f32 %v1924_v31, %v568_v63  ;;  %v466_v1 = vadd.f32 %v434_v43, %v398_v57  ;;  %v2137_v13 = vadd.f32 %v500_v52, %v464_v12 }
  0x41   : > { %3180 = vst [vmem:[#allocation22_spill] sm:$0xff] %v2128_v7  ;;  %3181 = vst [vmem:[#allocation23_spill] sm:$0xff] %v2131_v25  ;;  %v401_v60 = vmul.f32 %v1913_v17, %v361_v33  ;;  %v436_v36 = vmul.f32 %v1922_v30, %v362_v54  ;;  %v501_v46 = vmul.f32 %v1932_v34, %v361_v33 }
  0x42   : > { %3182 = vst [vmem:[#allocation24_spill] sm:$0xff] %v2134_v42  ;;  %346 = vst.msk [vmem:[#allocation2 + $0x189] sm:$0xff] %vm236_vm0, %v313_v8  ;;  %v2143_v7 = vmul.f32 %v1920_v24, %v569_v20  ;;  %v2146_v25 = vmul.f32 %v1944_v40, %v569_v20  ;;  %v2149_v63 = vmul.f32 %v1924_v31, %v569_v20  ;;  %v364_v8 = vld [vmem:[#allocation2 + $0xa8] sm:$0xff] }
  0x43   : > { %v467_v57 = vadd.f32 %v435_v51, %v399_v55  ;;  %v402_v12 = vmul.f32 %v1913_v17, %v362_v54  ;;  %v502_v52 = vmul.f32 %v1932_v34, %v362_v54  ;;  %v437_v43 = vmul.f32 %v1922_v30, %v363_v19 }
  0x44   : > { %3183 = vst [vmem:[#allocation25_spill] sm:$0xff] %v2143_v7  ;;  %3184 = vst [vmem:[#allocation26_spill] sm:$0xff] %v2146_v25  ;;  %v2154_v26 = vadd.f32 %v501_v46, %v465_v18  ;;  %v2157_v33 = vmul.f32 %v1920_v24, %v570_v56  ;;  %v2160_v7 = vmul.f32 %v1944_v40, %v570_v56  ;;  %v365_v25 = vld [vmem:[#allocation2 + $0xb0] sm:$0xff] }
  0x45   : > { %3185 = vst [vmem:[#allocation27_spill] sm:$0xff] %v2149_v63  ;;  %v2163_v20 = vmul.f32 %v1924_v31, %v570_v56  ;;  %v468_v51 = vadd.f32 %v436_v36, %v400_v6  ;;  %v2165_v55 = vadd.f32 %v502_v52, %v466_v1  ;;  %v403_v54 = vmul.f32 %v1913_v17, %v363_v19 }
  0x46   : > { %3186 = vst [vmem:[#allocation28_spill] sm:$0xff] %v2154_v26  ;;  %3187 = vst [vmem:[#allocation29_spill] sm:$0xff] %v2157_v33  ;;  %v438_v63 = vmul.f32 %v1922_v30, %v364_v8  ;;  %v503_v18 = vmul.f32 %v1932_v34, %v363_v19  ;;  %v2171_v46 = vmul.f32 %v1920_v24, %v571_v27  ;;  %v574_v26 = vld [vmem:[#allocation2 + $0xc1] sm:$0xff] }
  0x47   : > { %3188 = vst [vmem:[#allocation30_spill] sm:$0xff] %v2160_v7  ;;  %3189 = vst [vmem:[#allocation31_spill] sm:$0xff] %v2163_v20  ;;  %v2174_v33 = vmul.f32 %v1944_v40, %v571_v27  ;;  %v2177_v56 = vmul.f32 %v1924_v31, %v571_v27  ;;  %v366_v7 = vld [vmem:[#allocation2 + $0xc0] sm:$0xff]  ;;  %v469_v6 = vadd.f32 %v437_v43, %v401_v60  ;;  %v573_v20 = vld [vmem:[#allocation2 + $0xb1] sm:$0xff] }
  0x48   : > { %3190 = vst [vmem:[#allocation32_spill] sm:$0xff] %v2165_v55  ;;  %3191 = vst [vmem:[#allocation33_spill] sm:$0xff] %v2171_v46  ;;  %v404_v1 = vmul.f32 %v1913_v17, %v364_v8  ;;  %v504_v36 = vmul.f32 %v1932_v34, %v364_v8  ;;  %v439_v52 = vmul.f32 %v1922_v30, %v365_v25 }
  0x49   : > { %3192 = vst [vmem:[#allocation34_spill] sm:$0xff] %v2174_v33  ;;  %3193 = vst [vmem:[#allocation35_spill] sm:$0xff] %v2177_v56  ;;  %v2182_v55 = vadd.f32 %v503_v18, %v467_v57  ;;  %v2185_v19 = vmul.f32 %v1920_v24, %v572_v59  ;;  %v2188_v46 = vmul.f32 %v1944_v40, %v572_v59  ;;  %v367_v33 = vld [vmem:[#allocation2 + $0xc8] sm:$0xff] }
  0x4a   : > { %v2191_v27 = vmul.f32 %v1924_v31, %v572_v59  ;;  %v470_v60 = vadd.f32 %v438_v63, %v402_v12  ;;  %v2193_v43 = vadd.f32 %v504_v36, %v468_v51  ;;  %v405_v8 = vmul.f32 %v1913_v17, %v365_v25 }
  0x4b   : > { %3194 = vst [vmem:[#allocation36_spill] sm:$0xff] %v2182_v55  ;;  %3195 = vst [vmem:[#allocation37_spill] sm:$0xff] %v2185_v19  ;;  %v440_v56 = vmul.f32 %v1922_v30, %v366_v7  ;;  %v505_v57 = vmul.f32 %v1932_v34, %v365_v25  ;;  %v2199_v18 = vmul.f32 %v1920_v24, %v573_v20  ;;  %v576_v55 = vld [vmem:[#allocation2 + $0xd9] sm:$0xff] }
  0x4c   : > { %3196 = vst [vmem:[#allocation38_spill] sm:$0xff] %v2188_v46  ;;  %3197 = vst [vmem:[#allocation39_spill] sm:$0xff] %v2191_v27  ;;  %v2202_v19 = vmul.f32 %v1944_v40, %v573_v20  ;;  %v2205_v59 = vmul.f32 %v1924_v31, %v573_v20  ;;  %v368_v46 = vld [vmem:[#allocation2 + $0xd8] sm:$0xff]  ;;  %v471_v63 = vadd.f32 %v439_v52, %v403_v54  ;;  %v575_v27 = vld [vmem:[#allocation2 + $0xc9] sm:$0xff] }
  0x4d   : > { %3198 = vst [vmem:[#allocation40_spill] sm:$0xff] %v2193_v43  ;;  %3199 = vst [vmem:[#allocation41_spill] sm:$0xff] %v2199_v18  ;;  %v406_v12 = vmul.f32 %v1913_v17, %v366_v7  ;;  %v506_v51 = vmul.f32 %v1932_v34, %v366_v7  ;;  %v441_v36 = vmul.f32 %v1922_v30, %v367_v33 }
  0x4e   : > { %3200 = vst [vmem:[#allocation42_spill] sm:$0xff] %v2202_v19  ;;  %3201 = vst [vmem:[#allocation43_spill] sm:$0xff] %v2205_v59  ;;  %v2210_v43 = vadd.f32 %v505_v57, %v469_v6  ;;  %v2213_v25 = vmul.f32 %v1920_v24, %v574_v26  ;;  %v2216_v18 = vmul.f32 %v1944_v40, %v574_v26  ;;  %v369_v19 = vld [vmem:[#allocation2 + $0xe0] sm:$0xff] }
  0x4f   : > { %v2219_v20 = vmul.f32 %v1924_v31, %v574_v26  ;;  %v472_v54 = vadd.f32 %v440_v56, %v404_v1  ;;  %v407_v52 = vmul.f32 %v1913_v17, %v367_v33  ;;  %v473_v59 = vadd.f32 %v441_v36, %v405_v8  ;;  %v370_v26 = vld [vmem:[#allocation2 + $0xf0] sm:$0xff]  ;;  %v577_v36 = vld [vmem:[#allocation2 + $0xe1] sm:$0xff] }
  0x50   : > { %3202 = vst [vmem:[#allocation44_spill] sm:$0xff] %v2213_v25  ;;  %3203 = vst [vmem:[#allocation45_spill] sm:$0xff] %v2216_v18  ;;  %v442_v7 = vmul.f32 %v1922_v30, %v368_v46  ;;  %v2223_v42 = vadd.f32 %v506_v51, %v470_v60  ;;  %v507_v6 = vmul.f32 %v1932_v34, %v367_v33 }
  0x51   : > { %3204 = vst [vmem:[#allocation46_spill] sm:$0xff] %v2219_v20  ;;  %v2227_v57 = vmul.f32 %v1920_v24, %v575_v27  ;;  %v2230_v25 = vmul.f32 %v1944_v40, %v575_v27  ;;  %v2233_v18 = vmul.f32 %v1924_v31, %v575_v27  ;;  %v408_v56 = vmul.f32 %v1913_v17, %v368_v46  ;;  %v578_v20 = vld [vmem:[#allocation2 + $0xf1] sm:$0xff] }
  0x52   : > { %3205 = vst [vmem:[#allocation47_spill] sm:$0xff] %v2223_v42  ;;  %v474_v1 = vadd.f32 %v442_v7, %v406_v12  ;;  %v443_v8 = vmul.f32 %v1922_v30, %v369_v19  ;;  %v2237_v60 = vadd.f32 %v507_v6, %v471_v63  ;;  %v508_v33 = vmul.f32 %v1932_v34, %v368_v46 }
  0x53   : > { %3206 = vst [vmem:[#allocation48_spill] sm:$0xff] %v2227_v57  ;;  %3207 = vst [vmem:[#allocation49_spill] sm:$0xff] %v2230_v25  ;;  %v2241_v51 = vmul.f32 %v1920_v24, %v576_v55  ;;  %v2244_v57 = vmul.f32 %v1944_v40, %v576_v55  ;;  %v371_v25 = vld [vmem:[#allocation2 + $0xf8] sm:$0xff]  ;;  %v2247_v27 = vmul.f32 %v1924_v31, %v576_v55 }
  0x54   : > { %3208 = vst [vmem:[#allocation50_spill] sm:$0xff] %v2233_v18  ;;  %3209 = vst [vmem:[#allocation51_spill] sm:$0xff] %v2237_v60  ;;  %v409_v18 = vmul.f32 %v1913_v17, %v369_v19  ;;  %v475_v12 = vadd.f32 %v443_v8, %v407_v52  ;;  %v444_v7 = vmul.f32 %v1922_v30, %v370_v26  ;;  %v579_v60 = vld [vmem:[#allocation2 + $0xf9] sm:$0xff] }
  0x55   : > { %3210 = vst [vmem:[#allocation52_spill] sm:$0xff] %v2241_v51  ;;  %3211 = vst [vmem:[#allocation53_spill] sm:$0xff] %v2244_v57  ;;  %v2251_v63 = vadd.f32 %v508_v33, %v472_v54  ;;  %v509_v46 = vmul.f32 %v1932_v34, %v369_v19  ;;  %v2255_v6 = vmul.f32 %v1920_v24, %v577_v36  ;;  %v372_v57 = vld [vmem:[#allocation2 + $0x108] sm:$0xff] }
  0x56   : > { %3212 = vst [vmem:[#allocation54_spill] sm:$0xff] %v2247_v27  ;;  %v2258_v51 = vmul.f32 %v1944_v40, %v577_v36  ;;  %v2261_v55 = vmul.f32 %v1924_v31, %v577_v36  ;;  %v410_v27 = vmul.f32 %v1913_v17, %v370_v26  ;;  %v476_v52 = vadd.f32 %v444_v7, %v408_v56 }
  0x57   : > { %3213 = vst [vmem:[#allocation55_spill] sm:$0xff] %v2251_v63  ;;  %3214 = vst [vmem:[#allocation56_spill] sm:$0xff] %v2255_v6  ;;  %v445_v8 = vmul.f32 %v1922_v30, %v371_v25  ;;  %v2265_v54 = vadd.f32 %v509_v46, %v473_v59  ;;  %v510_v19 = vmul.f32 %v1932_v34, %v370_v26  ;;  %v580_v63 = vld [vmem:[#allocation2 + $0x109] sm:$0xff] }
  0x58   : > { %3215 = vst [vmem:[#allocation57_spill] sm:$0xff] %v2258_v51  ;;  %3216 = vst [vmem:[#allocation58_spill] sm:$0xff] %v2261_v55  ;;  %v2269_v33 = vmul.f32 %v1920_v24, %v578_v20  ;;  %v2272_v6 = vmul.f32 %v1944_v40, %v578_v20  ;;  %v373_v51 = vld [vmem:[#allocation2 + $0x110] sm:$0xff]  ;;  %v2275_v36 = vmul.f32 %v1924_v31, %v578_v20 }
  0x59   : > { %3217 = vst [vmem:[#allocation59_spill] sm:$0xff] %v2265_v54  ;;  %v411_v55 = vmul.f32 %v1913_v17, %v371_v25  ;;  %v477_v56 = vadd.f32 %v445_v8, %v409_v18  ;;  %v446_v7 = vmul.f32 %v1922_v30, %v372_v57  ;;  %v2279_v59 = vadd.f32 %v510_v19, %v474_v1  ;;  %v581_v54 = vld [vmem:[#allocation2 + $0x111] sm:$0xff] }
  0x5a   : > { %3218 = vst [vmem:[#allocation60_spill] sm:$0xff] %v2269_v33  ;;  %3219 = vst [vmem:[#allocation61_spill] sm:$0xff] %v2272_v6  ;;  %v511_v26 = vmul.f32 %v1932_v34, %v371_v25  ;;  %v2283_v46 = vmul.f32 %v1920_v24, %v579_v60  ;;  %v2286_v33 = vmul.f32 %v1944_v40, %v579_v60  ;;  %v374_v6 = vld [vmem:[#allocation2 + $0x120] sm:$0xff] }
  0x5b   : > { %3220 = vst [vmem:[#allocation62_spill] sm:$0xff] %v2275_v36  ;;  %3221 = vst [vmem:[#allocation63_spill] sm:$0xff] %v2279_v59  ;;  %v2289_v20 = vmul.f32 %v1924_v31, %v579_v60  ;;  %v412_v36 = vmul.f32 %v1913_v17, %v372_v57  ;;  %v478_v18 = vadd.f32 %v446_v7, %v410_v27  ;;  %v582_v59 = vld [vmem:[#allocation2 + $0x121] sm:$0xff] }
  0x5c   : > { %3222 = vst [vmem:[#allocation64_spill] sm:$0xff] %v2283_v46  ;;  %3223 = vst [vmem:[#allocation65_spill] sm:$0xff] %v2286_v33  ;;  %v447_v8 = vmul.f32 %v1922_v30, %v373_v51  ;;  %v2293_v1 = vadd.f32 %v511_v26, %v475_v12  ;;  %v512_v25 = vmul.f32 %v1932_v34, %v372_v57  ;;  %v375_v33 = vld [vmem:[#allocation2 + $0x128] sm:$0xff] }
  0x5d   : > { %3224 = vst [vmem:[#allocation66_spill] sm:$0xff] %v2289_v20  ;;  %v2297_v19 = vmul.f32 %v1920_v24, %v580_v63  ;;  %v2300_v46 = vmul.f32 %v1944_v40, %v580_v63  ;;  %v2303_v60 = vmul.f32 %v1924_v31, %v580_v63  ;;  %v413_v20 = vmul.f32 %v1913_v17, %v373_v51 }
  0x5e   : > { %3225 = vst [vmem:[#allocation67_spill] sm:$0xff] %v2293_v1  ;;  %v479_v27 = vadd.f32 %v447_v8, %v411_v55  ;;  %v448_v7 = vmul.f32 %v1922_v30, %v374_v6  ;;  %v2307_v12 = vadd.f32 %v512_v25, %v476_v52  ;;  %v513_v57 = vmul.f32 %v1932_v34, %v373_v51  ;;  %v583_v1 = vld [vmem:[#allocation2 + $0x129] sm:$0xff] }
  0x5f   : > { %3226 = vst [vmem:[#allocation68_spill] sm:$0xff] %v2297_v19  ;;  %3227 = vst [vmem:[#allocation69_spill] sm:$0xff] %v2300_v46  ;;  %v2311_v26 = vmul.f32 %v1920_v24, %v581_v54  ;;  %v2314_v19 = vmul.f32 %v1944_v40, %v581_v54  ;;  %v376_v46 = vld [vmem:[#allocation2 + $0x138] sm:$0xff]  ;;  %v2317_v63 = vmul.f32 %v1924_v31, %v581_v54 }
  0x60   : > { %3228 = vst [vmem:[#allocation70_spill] sm:$0xff] %v2303_v60  ;;  %3229 = vst [vmem:[#allocation71_spill] sm:$0xff] %v2307_v12  ;;  %v414_v60 = vmul.f32 %v1913_v17, %v374_v6  ;;  %v480_v55 = vadd.f32 %v448_v7, %v412_v36  ;;  %v449_v8 = vmul.f32 %v1922_v30, %v375_v33  ;;  %v584_v12 = vld [vmem:[#allocation2 + $0x139] sm:$0xff] }
  0x61   : > { %3230 = vst [vmem:[#allocation72_spill] sm:$0xff] %v2311_v26  ;;  %3231 = vst [vmem:[#allocation73_spill] sm:$0xff] %v2314_v19  ;;  %v2321_v52 = vadd.f32 %v513_v57, %v477_v56  ;;  %v514_v51 = vmul.f32 %v1932_v34, %v374_v6  ;;  %v2325_v25 = vmul.f32 %v1920_v24, %v582_v59  ;;  %v377_v19 = vld [vmem:[#allocation2 + $0x140] sm:$0xff] }
  0x62   : > { %3232 = vst [vmem:[#allocation74_spill] sm:$0xff] %v2317_v63  ;;  %v2328_v26 = vmul.f32 %v1944_v40, %v582_v59  ;;  %v2331_v54 = vmul.f32 %v1924_v31, %v582_v59  ;;  %v415_v63 = vmul.f32 %v1913_v17, %v375_v33  ;;  %v481_v36 = vadd.f32 %v449_v8, %v413_v20 }
  0x63   : > { %3233 = vst [vmem:[#allocation75_spill] sm:$0xff] %v2321_v52  ;;  %3234 = vst [vmem:[#allocation76_spill] sm:$0xff] %v2325_v25  ;;  %v450_v7 = vmul.f32 %v1922_v30, %v376_v46  ;;  %v2335_v56 = vadd.f32 %v514_v51, %v478_v18  ;;  %v515_v6 = vmul.f32 %v1932_v34, %v375_v33  ;;  %v585_v52 = vld [vmem:[#allocation2 + $0x141] sm:$0xff] }
  0x64   : > { %3235 = vst [vmem:[#allocation77_spill] sm:$0xff] %v2328_v26  ;;  %3236 = vst [vmem:[#allocation78_spill] sm:$0xff] %v2331_v54  ;;  %v2339_v57 = vmul.f32 %v1920_v24, %v583_v1  ;;  %v2342_v25 = vmul.f32 %v1944_v40, %v583_v1  ;;  %v378_v26 = vld [vmem:[#allocation2 + $0x150] sm:$0xff]  ;;  %v2345_v59 = vmul.f32 %v1924_v31, %v583_v1 }
  0x65   : > { %3237 = vst [vmem:[#allocation79_spill] sm:$0xff] %v2335_v56  ;;  %v416_v54 = vmul.f32 %v1913_v17, %v376_v46  ;;  %v482_v20 = vadd.f32 %v450_v7, %v414_v60  ;;  %v451_v8 = vmul.f32 %v1922_v30, %v377_v19  ;;  %v2349_v18 = vadd.f32 %v515_v6, %v479_v27  ;;  %v586_v56 = vld [vmem:[#allocation2 + $0x151] sm:$0xff] }
  0x66   : > { %3238 = vst [vmem:[#allocation80_spill] sm:$0xff] %v2339_v57  ;;  %3239 = vst [vmem:[#allocation81_spill] sm:$0xff] %v2342_v25  ;;  %v516_v33 = vmul.f32 %v1932_v34, %v376_v46  ;;  %v2353_v51 = vmul.f32 %v1920_v24, %v584_v12  ;;  %v2356_v57 = vmul.f32 %v1944_v40, %v584_v12  ;;  %v379_v25 = vld [vmem:[#allocation2 + $0x158] sm:$0xff] }
  0x67   : > { %3240 = vst [vmem:[#allocation82_spill] sm:$0xff] %v2345_v59  ;;  %3241 = vst [vmem:[#allocation83_spill] sm:$0xff] %v2349_v18  ;;  %v2359_v1 = vmul.f32 %v1924_v31, %v584_v12  ;;  %v417_v59 = vmul.f32 %v1913_v17, %v377_v19  ;;  %v483_v60 = vadd.f32 %v451_v8, %v415_v63  ;;  %v587_v18 = vld [vmem:[#allocation2 + $0x159] sm:$0xff] }
  0x68   : > { %3242 = vst [vmem:[#allocation84_spill] sm:$0xff] %v2353_v51  ;;  %3243 = vst [vmem:[#allocation85_spill] sm:$0xff] %v2356_v57  ;;  %v452_v7 = vmul.f32 %v1922_v30, %v378_v26  ;;  %v2363_v27 = vadd.f32 %v516_v33, %v480_v55  ;;  %v517_v46 = vmul.f32 %v1932_v34, %v377_v19  ;;  %v380_v57 = vld [vmem:[#allocation2 + $0x168] sm:$0xff] }
  0x69   : > { %3244 = vst [vmem:[#allocation86_spill] sm:$0xff] %v2359_v1  ;;  %v2367_v6 = vmul.f32 %v1920_v24, %v585_v52  ;;  %v2370_v51 = vmul.f32 %v1944_v40, %v585_v52  ;;  %v2373_v12 = vmul.f32 %v1924_v31, %v585_v52  ;;  %v418_v1 = vmul.f32 %v1913_v17, %v378_v26 }
  0x6a   : > { %3245 = vst [vmem:[#allocation87_spill] sm:$0xff] %v2363_v27  ;;  %v484_v63 = vadd.f32 %v452_v7, %v416_v54  ;;  %v453_v8 = vmul.f32 %v1922_v30, %v379_v25  ;;  %v2377_v55 = vadd.f32 %v517_v46, %v481_v36  ;;  %v518_v19 = vmul.f32 %v1932_v34, %v378_v26  ;;  %v588_v27 = vld [vmem:[#allocation2 + $0x169] sm:$0xff] }
  0x6b   : > { %3246 = vst [vmem:[#allocation88_spill] sm:$0xff] %v2367_v6  ;;  %3247 = vst [vmem:[#allocation89_spill] sm:$0xff] %v2370_v51  ;;  %v2381_v33 = vmul.f32 %v1920_v24, %v586_v56  ;;  %v2384_v6 = vmul.f32 %v1944_v40, %v586_v56  ;;  %v381_v51 = vld [vmem:[#allocation2 + $0x170] sm:$0xff]  ;;  %v2387_v52 = vmul.f32 %v1924_v31, %v586_v56 }
  0x6c   : > { %3248 = vst [vmem:[#allocation90_spill] sm:$0xff] %v2373_v12  ;;  %3249 = vst [vmem:[#allocation91_spill] sm:$0xff] %v2377_v55  ;;  %v419_v12 = vmul.f32 %v1913_v17, %v379_v25  ;;  %v485_v54 = vadd.f32 %v453_v8, %v417_v59  ;;  %v454_v7 = vmul.f32 %v1922_v30, %v380_v57  ;;  %v589_v55 = vld [vmem:[#allocation2 + $0x171] sm:$0xff] }
  0x6d   : > { %3250 = vst [vmem:[#allocation92_spill] sm:$0xff] %v2381_v33  ;;  %3251 = vst [vmem:[#allocation93_spill] sm:$0xff] %v2384_v6  ;;  %v2391_v36 = vadd.f32 %v518_v19, %v482_v20  ;;  %v519_v26 = vmul.f32 %v1932_v34, %v379_v25  ;;  %v2395_v46 = vmul.f32 %v1920_v24, %v587_v18  ;;  %v382_v6 = vld [vmem:[#allocation2 + $0x180] sm:$0xff]  ;;  %v383_v20 = vld [vmem:[#allocation2 + $0x188] sm:$0xff] }
  0x6e   : > { %3252 = vst [vmem:[#allocation94_spill] sm:$0xff] %v2387_v52  ;;  %v2398_v33 = vmul.f32 %v1944_v40, %v587_v18  ;;  %v2401_v56 = vmul.f32 %v1924_v31, %v587_v18  ;;  %v420_v52 = vmul.f32 %v1913_v17, %v380_v57  ;;  %v486_v59 = vadd.f32 %v454_v7, %v418_v1 }
  0x6f   : > { %3253 = vst [vmem:[#allocation95_spill] sm:$0xff] %v2391_v36  ;;  %3254 = vst [vmem:[#allocation96_spill] sm:$0xff] %v2395_v46  ;;  %v455_v8 = vmul.f32 %v1922_v30, %v381_v51  ;;  %v2405_v19 = vadd.f32 %v519_v26, %v483_v60  ;;  %v520_v25 = vmul.f32 %v1932_v34, %v380_v57 }
  0x70   : > { %3255 = vst [vmem:[#allocation97_spill] sm:$0xff] %v2398_v33  ;;  %3256 = vst [vmem:[#allocation98_spill] sm:$0xff] %v2401_v56  ;;  %v2409_v46 = vmul.f32 %v1920_v24, %v588_v27  ;;  %v421_v33 = vmul.f32 %v1913_v17, %v381_v51  ;;  %v2413_v36 = vmul.f32 %v1944_v40, %v588_v27  ;;  %v590_v56 = vld [vmem:[#allocation2 + $0x181] sm:$0xff]  ;;  %v591_v17 = vld [vmem:[#allocation2 + $0x189] sm:$0xff] }
  0x71   : > { %v2416_v18 = vmul.f32 %v1924_v31, %v588_v27  ;;  %v487_v1 = vadd.f32 %v455_v8, %v419_v12  ;;  %v456_v7 = vmul.f32 %v1922_v30, %v382_v6  ;;  %v2419_v42 = vadd.f32 %v520_v25, %v484_v63  ;;  %v2434_v63 = vld [vmem:[%s3145_s1 + $0x8] ss:$0 sm:$0xff] }
  0x72   : > { %3257 = vst [vmem:[#allocation99_spill] sm:$0xff] %v2409_v46  ;;  %v521_v60 = vmul.f32 %v1932_v34, %v381_v51  ;;  %v2423_v57 = vmul.f32 %v1944_v40, %v589_v55  ;;  %v457_v26 = vmul.f32 %v1922_v30, %v383_v20  ;;  %v2427_v24 = vmul.f32 %v1924_v31, %v589_v55  ;;  %v800_v51 = vld [vmem:[#allocation2 + $0x1a] sm:$0xff] }
  0x73   : > { %v488_v46 = vadd.f32 %v456_v7, %v420_v52  ;;  %v522_v27 = vmul.f32 %v1932_v34, %v382_v6  ;;  %v523_v12 = vmul.f32 %v1932_v34, %v383_v20  ;;  %v2439_v25 = vmul.f32 %v1924_v31, %v590_v56  ;;  %v802_v52 = vld [vmem:[#allocation2 + $0x32] sm:$0xff]  ;;  %v801_v6 = vld [vmem:[#allocation2 + $0x22] sm:$0xff]  ;;  %v803_v7 = vld [vmem:[#allocation2 + $0x3a] sm:$0xff] }
  0x74   : > { %v2436_v8 = vadd.f32 %v521_v60, %v485_v54  ;;  %v2441_v30 = vadd.f32 %v457_v26, %v421_v33  ;;  %v630_v55 = vadd.f32 %v1958_v47, %v2023_v39  ;;  %v2450_v40 = vmul.f32 %v1924_v31, %v591_v17 }
  0x75   : > { %v2445_v34 = vadd.f32 %v522_v27, %v486_v59  ;;  %v2447_v20 = vadd.f32 %v523_v12, %v487_v1  ;;  %v631_v54 = vadd.f32 %v1968_v53, %v2040_v2  ;;  %v2455_v56 = vadd.f32 %v1979_v61, %v488_v46  ;;  %v804_v59 = vld [vmem:[#allocation2 + $0x4a] sm:$0xff]  ;;  %v2470_v46 = vld [vmem:[#allocation2 + $0x52] sm:$0xff] }
  0x76   : > { %v698_v33 = vadd.f32 %v1996_v14, %v630_v55  ;;  %v906_v47 = vmul.f32 %v1952_v44, %v800_v51  ;;  %v632_v39 = vadd.f32 %v1993_v10, %v2053_v23  ;;  %v974_v1 = vmul.f32 %v2434_v63, %v802_v52 }
  0x77   : > { %v699_v60 = vadd.f32 %v2006_v21, %v631_v54  ;;  %v907_v31 = vmul.f32 %v1952_v44, %v801_v6  ;;  %v975_v26 = vmul.f32 %v2434_v63, %v803_v7  ;;  %v840_v14 = vmul.f32 %v1941_v38, %v800_v51 }
  0x78   : > { %v766_v53 = vadd.f32 %v2021_v35, %v698_v33  ;;  %v700_v61 = vadd.f32 %v2018_v29, %v632_v39  ;;  %v633_v2 = vadd.f32 %v2000_v16, %v2078_v32  ;;  %v908_v23 = vmul.f32 %v1952_v44, %v802_v52 }
  0x79   : > { %v767_v10 = vadd.f32 %v2035_v50, %v699_v60  ;;  %v976_v21 = vmul.f32 %v2434_v63, %v804_v59  ;;  %v634_v17 = vadd.f32 %v2015_v28, %v2092_v11  ;;  %v841_v12 = vmul.f32 %v1941_v38, %v801_v6 }
  0x7a   : > { %v870_v35 = vadd.f32 %v1985_v0, %v766_v53  ;;  %v768_v29 = vadd.f32 %v2049_v15, %v700_v61  ;;  %v701_v27 = vadd.f32 %v2032_v49, %v633_v2  ;;  %v909_v16 = vmul.f32 %v1952_v44, %v803_v7  ;;  %v2487_v0 = vld [vmem:[#allocation2 + $0x62] sm:$0xff]  ;;  %v2501_v61 = vld [vmem:[#allocation2 + $0x6a] sm:$0xff] }
  0x7b   : > { %v871_v32 = vadd.f32 %v1990_v9, %v767_v10  ;;  %v977_v50 = vmul.f32 %v2434_v63, %v2470_v46  ;;  %v702_v51 = vadd.f32 %v2046_v4, %v634_v17  ;;  %v635_v28 = vadd.f32 %v2029_v48, %v2125_v58 }
  0x7c   : > { %v938_v55 = vadd.f32 %v906_v47, %v870_v35  ;;  %v872_v54 = vadd.f32 %v840_v14, %v768_v29  ;;  %v769_v11 = vadd.f32 %v2070_v37, %v701_v27  ;;  %v842_v9 = vmul.f32 %v1941_v38, %v802_v52 }
  0x7d   : > { %v939_v49 = vadd.f32 %v907_v31, %v871_v32  ;;  %v770_v15 = vadd.f32 %v2087_v41, %v702_v51  ;;  %v910_v6 = vmul.f32 %v1952_v44, %v804_v59  ;;  %v703_v4 = vadd.f32 %v2067_v22, %v635_v28 }
  0x7e   : > { %v1006_v33 = vadd.f32 %v974_v1, %v938_v55  ;;  %v940_v39 = vadd.f32 %v908_v23, %v872_v54  ;;  %v873_v60 = vadd.f32 %v841_v12, %v769_v11  ;;  %v978_v37 = vmul.f32 %v2434_v63, %v2487_v0 }
  0x7f   : > { %v1007_v47 = vadd.f32 %v975_v26, %v939_v49  ;;  %v874_v53 = vadd.f32 %v842_v9, %v770_v15  ;;  %v636_v48 = vadd.f32 %v2043_v3, %v2137_v13  ;;  %v771_v52 = vadd.f32 %v2110_v5, %v703_v4 }
  0x80   : > { %v1042_v58 = vadd.f32 %v1954_v45, %v1006_v33  ;;  %v1008_v41 = vadd.f32 %v976_v21, %v940_v39  ;;  %v941_v31 = vadd.f32 %v909_v16, %v873_v60  ;;  %v843_v22 = vmul.f32 %v1941_v38, %v803_v7  ;;  %v3258_v16 = vld [vmem:[#allocation24_spill] sm:$0xff] }
  0x81   : > { %v1043_v1 = vadd.f32 %v1954_v45, %v1007_v47  ;;  %v942_v14 = vadd.f32 %v910_v6, %v874_v53  ;;  %v704_v26 = vadd.f32 %v2084_v62, %v636_v48  ;;  %v911_v3 = vmul.f32 %v1952_v44, %v2470_v46 }
  0x82   : > { %v1106_v2 = vmul.f32 0.044715, %v1042_v58  ;;  %v1044_v10 = vadd.f32 %v1954_v45, %v1008_v41  ;;  %v1009_v23 = vadd.f32 %v977_v50, %v941_v31  ;;  %v875_v17 = vadd.f32 %v843_v22, %v771_v52 }
  0x83   : > { %v1107_v13 = vmul.f32 0.044715, %v1043_v1  ;;  %v1010_v21 = vadd.f32 %v978_v37, %v942_v14  ;;  %v979_v5 = vmul.f32 %v2434_v63, %v2501_v61  ;;  %v844_v7 = vmul.f32 %v1941_v38, %v804_v59  ;;  %v2519_v59 = vld [vmem:[#allocation2 + $0x7a] sm:$0xff] }
  0x84   : > { %v1138_v35 = vmul.f32 %v1106_v2, %v1042_v58  ;;  %v1108_v29 = vmul.f32 0.044715, %v1044_v10  ;;  %v1045_v27 = vadd.f32 %v1954_v45, %v1009_v23  ;;  %v943_v32 = vadd.f32 %v911_v3, %v875_v17  ;;  %v3260_v17 = vld [vmem:[#allocation18_spill] sm:$0xff] }
  0x85   : > { %v1139_v62 = vmul.f32 %v1107_v13, %v1043_v1  ;;  %v1046_v12 = vadd.f32 %v1954_v45, %v1010_v21  ;;  %v772_v50 = vadd.f32 %v3258_v16, %v704_v26  ;;  %v2515_v51 = vmul.f32 0.5, %v1042_v58  ;;  %v3259_v21 = vld [vmem:[#allocation28_spill] sm:$0xff]  ;;  %v3261_v16 = vld [vmem:[#allocation21_spill] sm:$0xff] }
  0x86   : > { %v1170_v55 = vmul.f32 %v1138_v35, %v1042_v58  ;;  %v1140_v54 = vmul.f32 %v1108_v29, %v1044_v10  ;;  %v1109_v11 = vmul.f32 0.044715, %v1045_v27  ;;  %v2517_v28 = vmul.f32 0.5, %v1043_v1 }
  0x87   : > { %v1171_v49 = vmul.f32 %v1139_v62, %v1043_v1  ;;  %v1110_v15 = vmul.f32 0.044715, %v1046_v12  ;;  %v1011_v9 = vadd.f32 %v979_v5, %v943_v32  ;;  %v876_v60 = vadd.f32 %v844_v7, %v772_v50 }
  0x88   : > { %v1202_v6 = vadd.f32 %v1170_v55, %v1042_v58  ;;  %v1172_v33 = vmul.f32 %v1140_v54, %v1044_v10  ;;  %v1141_v39 = vmul.f32 %v1109_v11, %v1045_v27  ;;  %v2521_v47 = vmul.f32 0.5, %v1044_v10  ;;  %v2535_v55 = vld [vmem:[#allocation2 + $0x82] sm:$0xff] }
  0x89   : > { %v1203_v4 = vadd.f32 %v1171_v49, %v1043_v1  ;;  %v1142_v53 = vmul.f32 %v1110_v15, %v1046_v12  ;;  %v1047_v37 = vadd.f32 %v1954_v45, %v1011_v9  ;;  %v912_v52 = vmul.f32 %v1952_v44, %v2487_v0  ;;  %v3262_v49 = vld [vmem:[#allocation32_spill] sm:$0xff]  ;;  %v3263_v15 = vld [vmem:[#allocation19_spill] sm:$0xff] }
  0x8a   : > { %v1234_v48 = vmul.f32 0.7978846, %v1202_v6  ;;  %v1204_v41 = vadd.f32 %v1172_v33, %v1044_v10  ;;  %v1173_v31 = vmul.f32 %v1141_v39, %v1045_v27  ;;  %v980_v26 = vmul.f32 %v2434_v63, %v2519_v59  ;;  %v3264_v6 = vld [vmem:[#allocation27_spill] sm:$0xff] }
  0x8b   : > { %v1235_v14 = vmul.f32 0.7978846, %v1203_v4  ;;  %v1174_v22 = vmul.f32 %v1142_v53, %v1046_v12  ;;  %v1111_v58 = vmul.f32 0.044715, %v1047_v37  ;;  %v944_v23 = vadd.f32 %v912_v52, %v876_v60  ;;  %v2547_v39 = vld [vmem:[#allocation2 + $0x92] sm:$0xff] }
  0x8c   : > { %1685 = vtanh.f32 %v1234_v48  ;;  %v1236_v2 = vmul.f32 0.7978846, %v1204_v41  ;;  %v1205_v1 = vadd.f32 %v1173_v31, %v1045_v27  ;;  %v637_v10 = vadd.f32 %v3260_v17, %v3259_v21  ;;  %v3265_v48 = vld [vmem:[#allocation23_spill] sm:$0xff]  ;;  %v3269_v21 = vld [vmem:[#allocation26_spill] sm:$0xff] }
  0x8d   : > { %1687 = vtanh.f32 %v1235_v14  ;;  %v1206_v3 = vadd.f32 %v1174_v22, %v1046_v12  ;;  %v1143_v13 = vmul.f32 %v1111_v58, %v1047_v37  ;;  %v2530_v5 = vmul.f32 0.5, %v1045_v27  ;;  %v3266_v14 = vld [vmem:[#allocation36_spill] sm:$0xff] }
  0x8e   : > { %1689 = vtanh.f32 %v1236_v2  ;;  %v1237_v35 = vmul.f32 0.7978846, %v1205_v1  ;;  %v1012_v29 = vadd.f32 %v980_v26, %v944_v23  ;;  %v2532_v7 = vmul.f32 0.5, %v1046_v12  ;;  %v3267_v22 = vld [vmem:[#allocation20_spill] sm:$0xff]  ;;  %v3268_v26 = vld [vmem:[#allocation31_spill] sm:$0xff] }
  0x8f   : > { %v1238_v62 = vmul.f32 0.7978846, %v1206_v3  ;;  %v1175_v32 = vmul.f32 %v1143_v13, %v1047_v37  ;;  %v705_v50 = vadd.f32 %v3261_v16, %v637_v10  ;;  %v2537_v54 = vmul.f32 0.5, %v1047_v37  ;;  %v2565_v3 = vld [vmem:[#allocation2 + $0x9a] sm:$0xff]  ;;  %v3271_v16 = vld [vmem:[#allocation22_spill] sm:$0xff] }
  0x90   : > { %1691 = vtanh.f32 %v1237_v35  ;;  %v2540_v11 = vadd.f32 %v1954_v45, %v1012_v29  ;;  %v638_v27 = vadd.f32 %v3263_v15, %v3262_v49  ;;  %v845_v33 = vmul.f32 %v1941_v38, %v2470_v46 }
  0x91   : > { %1693 = vtanh.f32 %v1238_v62  ;;  %v1207_v9 = vadd.f32 %v1175_v32, %v1047_v37  ;;  %v773_v12 = vadd.f32 %v3264_v6, %v705_v50  ;;  %v913_v4 = vmul.f32 %v1952_v44, %v2501_v61  ;;  %v3270_v32 = vld [vmem:[#allocation40_spill] sm:$0xff] }
  0x92   : > { %v1112_v60 = vmul.f32 0.044715, %v2540_v11  ;;  %v981_v53 = vmul.f32 %v2434_v63, %v2535_v55  ;;  %v706_v41 = vadd.f32 %v3265_v48, %v638_v27  ;;  %v846_v37 = vmul.f32 %v1941_v38, %v2487_v0  ;;  %v3273_v48 = vld [vmem:[#allocation30_spill] sm:$0xff] }
  0x93   : > { %v1239_v31 = vmul.f32 0.7978846, %v1207_v9  ;;  %v877_v52 = vadd.f32 %v845_v33, %v773_v12  ;;  %v639_v46 = vadd.f32 %v3267_v22, %v3266_v14  ;;  %v914_v1 = vmul.f32 %v1952_v44, %v2519_v59  ;;  %v3272_v9 = vld [vmem:[#allocation35_spill] sm:$0xff] }
  0x94   : > { %v1144_v58 = vmul.f32 %v1112_v60, %v2540_v11  ;;  %v774_v2 = vadd.f32 %v3268_v26, %v706_v41  ;;  %v982_v23 = vmul.f32 %v2434_v63, %v2547_v39  ;;  %v847_v0 = vmul.f32 %v1941_v38, %v2501_v61 }
  0x95   : > { %1695 = vtanh.f32 %v1239_v31  ;;  %v945_v13 = vadd.f32 %v913_v4, %v877_v52  ;;  %v707_v17 = vadd.f32 %v3269_v21, %v639_v46  ;;  %v915_v62 = vmul.f32 %v1952_v44, %v2535_v55 }
  0x96   : > { %v1686_v10 = vpop.eup %1685  ;;  %v1176_v35 = vmul.f32 %v1144_v58, %v2540_v11  ;;  %v878_v29 = vadd.f32 %v846_v37, %v774_v2  ;;  %v640_v50 = vadd.f32 %v3271_v16, %v3270_v32  ;;  %v983_v12 = vmul.f32 %v2434_v63, %v2565_v3  ;;  %v3276_v32 = vld [vmem:[#allocation14_spill] sm:$0xff] }
  0x97   : > { %v1688_v49 = vpop.eup %1687  ;;  %v1298_v15 = vadd.f32 1.0, %v1686_v10  ;;  %v1013_v27 = vadd.f32 %v981_v53, %v945_v13  ;;  %v775_v6 = vadd.f32 %v3272_v9, %v707_v17  ;;  %v848_v53 = vmul.f32 %v1941_v38, %v2519_v59  ;;  %v3274_v13 = vld [vmem:[#allocation13_spill] sm:$0xff]  ;;  %v3277_v9 = vld [vmem:[#allocation3_spill] sm:$0xff] }
  0x98   : > { %v1690_v33 = vpop.eup %1689  ;;  %v1299_v61 = vadd.f32 1.0, %v1688_v49  ;;  %v1208_v60 = vadd.f32 %v1176_v35, %v2540_v11  ;;  %v946_v4 = vadd.f32 %v914_v1, %v878_v29  ;;  %v708_v41 = vadd.f32 %v3273_v48, %v640_v50 }
  0x99   : > { %v1330_v31 = vmul.f32 %v1298_v15, %v2515_v51  ;;  %v1300_v52 = vadd.f32 1.0, %v1690_v33  ;;  %v1049_v37 = vadd.f32 %v1954_v45, %v1013_v27  ;;  %v879_v26 = vadd.f32 %v847_v0, %v775_v6  ;;  %v3275_v51 = vld [vmem:[#allocation39_spill] sm:$0xff] }
  0x9a   : > { %v1692_v14 = vpop.eup %1691  ;;  %v1331_v22 = vmul.f32 %v1299_v61, %v2517_v28  ;;  %v1240_v46 = vmul.f32 0.7978846, %v1208_v60  ;;  %v1014_v58 = vadd.f32 %v982_v23, %v946_v4  ;;  %v776_v10 = vadd.f32 %v3275_v51, %v708_v41  ;;  %v3278_v60 = vld [vmem:[#allocation4_spill] sm:$0xff] }
  0x9b   : > { %v1694_v2 = vpop.eup %1693  ;;  %v1366_v1 = vmul.f32 %v3274_v13, %v1330_v31  ;;  %v1332_v21 = vmul.f32 %v1300_v52, %v2521_v47  ;;  %v1301_v17 = vadd.f32 1.0, %v1692_v14  ;;  %v1113_v59 = vmul.f32 0.044715, %v1049_v37  ;;  %v2609_v31 = vld [vmem:[#allocation2 + $0xaa] sm:$0xff] }
  0x9c   : > { %v1367_v35 = vmul.f32 %v3274_v13, %v1331_v22  ;;  %v1302_v29 = vadd.f32 1.0, %v1694_v2  ;;  %1697 = vtanh.f32 %v1240_v46  ;;  %v1050_v0 = vadd.f32 %v1954_v45, %v1014_v58 }
  0x9d   : > { %v1402_v16 = vadd.f32 %v3276_v32, %v1366_v1  ;;  %v1368_v28 = vmul.f32 %v3274_v13, %v1332_v21  ;;  %v1333_v23 = vmul.f32 %v1301_v17, %v2530_v5  ;;  %v1145_v49 = vmul.f32 %v1113_v59, %v1049_v37  ;;  %v3280_v21 = vld [vmem:[#allocation6_spill] sm:$0xff] }
  0x9e   : > { %v1403_v47 = vadd.f32 %v3276_v32, %v1367_v35  ;;  %v1334_v50 = vmul.f32 %v1302_v29, %v2532_v7  ;;  %v947_v15 = vadd.f32 %v915_v62, %v879_v26  ;;  %v916_v61 = vmul.f32 %v1952_v44, %v2547_v39  ;;  %v3279_v62 = vld [vmem:[#allocation5_spill] sm:$0xff] }
  0x9f   : > { %v1696_v27 = vpop.eup %1695  ;;  %v1466_v6 = vadd.f32 %v1402_v16, %v3277_v9  ;;  %v1404_v5 = vadd.f32 %v3276_v32, %v1368_v28  ;;  %v1369_v33 = vmul.f32 %v3274_v13, %v1333_v23  ;;  %v1177_v7 = vmul.f32 %v1145_v49, %v1049_v37 }
  0xa0   : > { %v1467_v4 = vadd.f32 %v1403_v47, %v3278_v60  ;;  %v1370_v48 = vmul.f32 %v3274_v13, %v1334_v50  ;;  %v1303_v41 = vadd.f32 1.0, %v1696_v27  ;;  %v1114_v22 = vmul.f32 0.044715, %v1050_v0  ;;  %v3282_v47 = vld [vmem:[#allocation25_spill] sm:$0xff] }
  0xa1   : > { %1498 = vst.msk [vmem:[%s2598_s28] sm:$0xff] %vm236_vm0, %v1466_v6  ;;  %v1468_v52 = vadd.f32 %v1404_v5, %v3279_v62  ;;  %v1405_v14 = vadd.f32 %v3276_v32, %v1369_v33  ;;  %v1015_v46 = vadd.f32 %v983_v12, %v947_v15  ;;  %v1209_v2 = vadd.f32 %v1177_v7, %v1049_v37  ;;  %v3281_v12 = vld [vmem:[#allocation7_spill] sm:$0xff] }
  0xa2   : > { %1499 = vst.msk [vmem:[%s2598_s28 + $0x8] sm:$0xff] %vm236_vm0, %v1467_v4  ;;  %v1406_v58 = vadd.f32 %v3276_v32, %v1370_v48  ;;  %v1335_v26 = vmul.f32 %v1303_v41, %v2537_v54  ;;  %v880_v1 = vadd.f32 %v848_v53, %v776_v10  ;;  %v1146_v51 = vmul.f32 %v1114_v22, %v1050_v0  ;;  %v2645_v22 = vld [vmem:[#allocation2 + $0xb2] sm:$0xff] }
  0xa3   : > { %1500 = vst.msk [vmem:[%s2598_s28 + $0x10] sm:$0xff] %vm236_vm0, %v1468_v52  ;;  %v1469_v17 = vadd.f32 %v1405_v14, %v3280_v21  ;;  %v1051_v35 = vadd.f32 %v1954_v45, %v1015_v46  ;;  %v984_v29 = vmul.f32 %v2434_v63, %v2609_v31  ;;  %v1241_v28 = vmul.f32 0.7978846, %v1209_v2  ;;  %v3285_v52 = vld [vmem:[#allocation43_spill] sm:$0xff]  ;;  %v3287_v2 = vld [vmem:[#allocation29_spill] sm:$0xff] }
  0xa4   : > { %v1470_v59 = vadd.f32 %v1406_v58, %v3281_v12  ;;  %v1371_v16 = vmul.f32 %v3274_v13, %v1335_v26  ;;  %v948_v23 = vadd.f32 %v916_v61, %v880_v1  ;;  %v1080_v54 = vmul.f32 0.5, %v2540_v11  ;;  %v3283_v61 = vld [vmem:[#allocation34_spill] sm:$0xff]  ;;  %v3284_v11 = vld [vmem:[#allocation8_spill] sm:$0xff]  ;;  %v3286_v26 = vld [vmem:[#allocation47_spill] sm:$0xff] }
  0xa5   : > { %1501 = vst.msk [vmem:[%s2598_s28 + $0x18] sm:$0xff] %vm236_vm0, %v1469_v17  ;;  %v1178_v53 = vmul.f32 %v1146_v51, %v1050_v0  ;;  %v1115_v10 = vmul.f32 0.044715, %v1051_v35  ;;  %v641_v50 = vadd.f32 %v3282_v47, %v2210_v43  ;;  %v1081_v27 = vmul.f32 0.5, %v1049_v37  ;;  %v2657_v51 = vld [vmem:[#allocation2 + $0xc2] sm:$0xff] }
  0xa6   : > { %v1698_v49 = vpop.eup %1697  ;;  %1502 = vst.msk [vmem:[%s2598_s28 + $0x20] sm:$0xff] %vm236_vm0, %v1470_v59  ;;  %v1407_v15 = vadd.f32 %v3276_v32, %v1371_v16  ;;  %1699 = vtanh.f32 %v1241_v28  ;;  %v1016_v9 = vadd.f32 %v984_v29, %v948_v23  ;;  %v2637_v48 = vmul.f32 0.5, %v1050_v0  ;;  %v3288_v59 = vld [vmem:[#allocation38_spill] sm:$0xff]  ;;  %v3290_v47 = vld [vmem:[#allocation33_spill] sm:$0xff] }
  0xa7   : > { %v1304_v6 = vadd.f32 1.0, %v1698_v49  ;;  %v1210_v5 = vadd.f32 %v1178_v53, %v1050_v0  ;;  %v1147_v33 = vmul.f32 %v1115_v10, %v1051_v35  ;;  %v709_v60 = vadd.f32 %v3283_v61, %v641_v50  ;;  %v3289_v10 = vld [vmem:[#allocation51_spill] sm:$0xff]  ;;  %v3291_v49 = vld [vmem:[#allocation46_spill] sm:$0xff] }
  0xa8   : > { %v1471_v4 = vadd.f32 %v1407_v15, %v3284_v11  ;;  %v2640_v43 = vadd.f32 %v1954_v45, %v1016_v9  ;;  %v849_v41 = vmul.f32 %v1941_v38, %v2535_v55  ;;  %v2649_v46 = vmul.f32 0.5, %v1051_v35  ;;  %v3293_v61 = vld [vmem:[#allocation42_spill] sm:$0xff] }
  0xa9   : > { %v1336_v7 = vmul.f32 %v1304_v6, %v1080_v54  ;;  %v1242_v37 = vmul.f32 0.7978846, %v1210_v5  ;;  %v1179_v62 = vmul.f32 %v1147_v33, %v1051_v35  ;;  %v777_v14 = vadd.f32 %v3285_v52, %v709_v60  ;;  %v3292_v5 = vld [vmem:[#allocation10_spill] sm:$0xff]  ;;  %v3295_v52 = vld [vmem:[#allocation37_spill] sm:$0xff] }
  0xaa   : > { %1503 = vst.msk [vmem:[%s2598_s28 + $0x28] sm:$0xff] %vm236_vm0, %v1471_v4  ;;  %v1116_v0 = vmul.f32 0.044715, %v2640_v43  ;;  %v917_v58 = vmul.f32 %v1952_v44, %v2565_v3  ;;  %v642_v1 = vadd.f32 %v3287_v2, %v3286_v26  ;;  %v985_v12 = vmul.f32 %v2434_v63, %v2645_v22  ;;  %v2676_v11 = vld [vmem:[#allocation2 + $0xca] sm:$0xff] }
  0xab   : > { %v1372_v55 = vmul.f32 %v3274_v13, %v1336_v7  ;;  %1701 = vtanh.f32 %v1242_v37  ;;  %v1211_v21 = vadd.f32 %v1179_v62, %v1051_v35  ;;  %v881_v17 = vadd.f32 %v849_v41, %v777_v14  ;;  %v3294_v62 = vld [vmem:[#allocation55_spill] sm:$0xff]  ;;  %v3296_v26 = vld [vmem:[#allocation50_spill] sm:$0xff] }
  0xac   : > { %v1148_v29 = vmul.f32 %v1116_v0, %v2640_v43  ;;  %v710_v16 = vadd.f32 %v3288_v59, %v642_v1  ;;  %v850_v28 = vmul.f32 %v1941_v38, %v2547_v39  ;;  %v643_v35 = vadd.f32 %v3290_v47, %v3289_v10 }
  0xad   : > { %v1408_v23 = vadd.f32 %v3276_v32, %v1372_v55  ;;  %v1243_v54 = vmul.f32 0.7978846, %v1211_v21  ;;  %v949_v53 = vadd.f32 %v917_v58, %v881_v17  ;;  %v918_v9 = vmul.f32 %v1952_v44, %v2609_v31 }
  0xae   : > { %v1180_v50 = vmul.f32 %v1148_v29, %v2640_v43  ;;  %v778_v15 = vadd.f32 %v3291_v49, %v710_v16  ;;  %v986_v6 = vmul.f32 %v2434_v63, %v2657_v51  ;;  %v711_v60 = vadd.f32 %v3293_v61, %v643_v35  ;;  %v3297_v29 = vld [vmem:[#allocation45_spill] sm:$0xff] }
  0xaf   : > { %v1472_v39 = vadd.f32 %v1408_v23, %v3292_v5  ;;  %1703 = vtanh.f32 %v1243_v54  ;;  %v1017_v33 = vadd.f32 %v985_v12, %v949_v53  ;;  %v851_v37 = vmul.f32 %v1941_v38, %v2565_v3  ;;  %v3298_v53 = vld [vmem:[#allocation54_spill] sm:$0xff] }
  0xb0   : > { %v1700_v4 = vpop.eup %1699  ;;  %v1212_v41 = vadd.f32 %v1180_v50, %v2640_v43  ;;  %v882_v7 = vadd.f32 %v850_v28, %v778_v15  ;;  %v644_v14 = vadd.f32 %v3295_v52, %v3294_v62  ;;  %v779_v2 = vadd.f32 %v3296_v26, %v711_v60  ;;  %v2692_v28 = vld [vmem:[#allocation2 + $0xda] sm:$0xff]  ;;  %v3302_v26 = vld [vmem:[#allocation11_spill] sm:$0xff] }
  0xb1   : > { %1504 = vst.msk [vmem:[%s2598_s28 + $0x30] sm:$0xff] %vm236_vm0, %v1472_v39  ;;  %v1305_v0 = vadd.f32 1.0, %v1700_v4  ;;  %v1053_v58 = vadd.f32 %v1954_v45, %v1017_v33  ;;  %v919_v1 = vmul.f32 %v1952_v44, %v2645_v22  ;;  %v987_v17 = vmul.f32 %v2434_v63, %v2676_v11 }
  0xb2   : > { %v1244_v55 = vmul.f32 0.7978846, %v1212_v41  ;;  %v950_v21 = vadd.f32 %v918_v9, %v882_v7  ;;  %v712_v3 = vadd.f32 %v3297_v29, %v644_v14  ;;  %v883_v16 = vadd.f32 %v851_v37, %v779_v2  ;;  %v3300_v9 = vld [vmem:[#allocation41_spill] sm:$0xff] }
  0xb3   : > { %v1337_v12 = vmul.f32 %v1305_v0, %v1081_v27  ;;  %v1117_v59 = vmul.f32 0.044715, %v1053_v58  ;;  %v852_v23 = vmul.f32 %v1941_v38, %v2609_v31  ;;  %v920_v47 = vmul.f32 %v1952_v44, %v2657_v51  ;;  %v3299_v27 = vld [vmem:[#allocation59_spill] sm:$0xff]  ;;  %v3301_v41 = vld [vmem:[#allocation49_spill] sm:$0xff] }
  0xb4   : > { %1705 = vtanh.f32 %v1244_v55  ;;  %v1018_v54 = vadd.f32 %v986_v6, %v950_v21  ;;  %v780_v10 = vadd.f32 %v3298_v53, %v712_v3  ;;  %v951_v15 = vadd.f32 %v919_v1, %v883_v16  ;;  %v3303_v21 = vld [vmem:[#allocation58_spill] sm:$0xff]  ;;  %v1442_v3 = vld [vmem:[%s1876_s21 + $0x40] sm:$0xff] }
  0xb5   : > { %v1702_v35 = vpop.eup %1701  ;;  %v1373_v50 = vmul.f32 %v3274_v13, %v1337_v12  ;;  %v1149_v49 = vmul.f32 %v1117_v59, %v1053_v58  ;;  %v645_v5 = vadd.f32 %v3300_v9, %v3299_v27  ;;  %v988_v31 = vmul.f32 %v2434_v63, %v2692_v28 }
  0xb6   : > { %v1306_v39 = vadd.f32 1.0, %v1702_v35  ;;  %v1054_v33 = vadd.f32 %v1954_v45, %v1018_v54  ;;  %v884_v61 = vadd.f32 %v852_v23, %v780_v10  ;;  %v1019_v4 = vadd.f32 %v987_v17, %v951_v15  ;;  %v2718_v54 = vld [vmem:[#allocation2 + $0xe2] sm:$0xff] }
  0xb7   : > { %v1409_v6 = vadd.f32 %v3276_v32, %v1373_v50  ;;  %v1181_v60 = vmul.f32 %v1149_v49, %v1053_v58  ;;  %v713_v7 = vadd.f32 %v3301_v41, %v645_v5  ;;  %v853_v14 = vmul.f32 %v1941_v38, %v2645_v22 }
  0xb8   : > { %v1338_v37 = vmul.f32 %v1306_v39, %v2637_v48  ;;  %v1118_v62 = vmul.f32 0.044715, %v1054_v33  ;;  %v952_v52 = vadd.f32 %v920_v47, %v884_v61  ;;  %v1055_v55 = vadd.f32 %v1954_v45, %v1019_v4 }
  0xb9   : > { %v1704_v0 = vpop.eup %1703  ;;  %v1473_v2 = vadd.f32 %v1409_v6, %v3302_v26  ;;  %v1213_v1 = vadd.f32 %v1181_v60, %v1053_v58  ;;  %v781_v29 = vadd.f32 %v3303_v21, %v713_v7  ;;  %v1084_v48 = vmul.f32 0.5, %v2640_v43 }
  0xba   : > { %v1374_v17 = vmul.f32 %v3274_v13, %v1338_v37  ;;  %v1307_v12 = vadd.f32 1.0, %v1704_v0  ;;  %v1150_v59 = vmul.f32 %v1118_v62, %v1054_v33  ;;  %v1020_v16 = vadd.f32 %v988_v31, %v952_v52  ;;  %v1443_v31 = vld [vmem:[%s1876_s21 + $0x48] sm:$0xff]  ;;  %v3304_v37 = vld [vmem:[#allocation63_spill] sm:$0xff]  ;;  %v3305_v62 = vld [vmem:[#allocation44_spill] sm:$0xff] }
  0xbb   : > { %1505 = vst.msk [vmem:[%s2598_s28 + $0x38] sm:$0xff] %vm236_vm0, %v1473_v2  ;;  %v1245_v23 = vmul.f32 0.7978846, %v1213_v1  ;;  %v1119_v22 = vmul.f32 0.044715, %v1055_v55  ;;  %v885_v53 = vadd.f32 %v853_v14, %v781_v29  ;;  %v1085_v49 = vmul.f32 0.5, %v1053_v58 }
  0xbc   : > { %v1410_v10 = vadd.f32 %v3276_v32, %v1374_v17  ;;  %v1339_v47 = vmul.f32 %v1307_v12, %v2649_v46  ;;  %v1182_v35 = vmul.f32 %v1150_v59, %v1054_v33  ;;  %v1056_v50 = vadd.f32 %v1954_v45, %v1020_v16  ;;  %v3306_v29 = vld [vmem:[#allocation53_spill] sm:$0xff]  ;;  %v2743_v16 = vld [vmem:[#allocation2 + $0xf2] sm:$0xff] }
  0xbd   : > { %1707 = vtanh.f32 %v1245_v23  ;;  %v1151_v15 = vmul.f32 %v1119_v22, %v1055_v55  ;;  %v921_v43 = vmul.f32 %v1952_v44, %v2676_v11  ;;  %v989_v61 = vmul.f32 %v2434_v63, %v2718_v54  ;;  %v3307_v22 = vld [vmem:[#allocation62_spill] sm:$0xff] }
  0xbe   : > { %v1706_v27 = vpop.eup %1705  ;;  %v1474_v9 = vadd.f32 %v1442_v3, %v1410_v10  ;;  %v1375_v5 = vmul.f32 %v3274_v13, %v1339_v47  ;;  %v1214_v39 = vadd.f32 %v1182_v35, %v1054_v33  ;;  %v1120_v60 = vmul.f32 0.044715, %v1056_v50  ;;  %v3308_v10 = vld [vmem:[#allocation67_spill] sm:$0xff]  ;;  %v3309_v47 = vld [vmem:[#allocation48_spill] sm:$0xff] }
  0xbf   : > { %v1308_v46 = vadd.f32 1.0, %v1706_v27  ;;  %v1183_v6 = vmul.f32 %v1151_v15, %v1055_v55  ;;  %v953_v4 = vadd.f32 %v921_v43, %v885_v53  ;;  %v2732_v41 = vmul.f32 0.5, %v1054_v33 }
  0xc0   : > { %1506 = vst.msk [vmem:[%s2598_s28 + $0x40] sm:$0xff] %vm236_vm0, %v1474_v9  ;;  %v1411_v58 = vadd.f32 %v3276_v32, %v1375_v5  ;;  %v1246_v7 = vmul.f32 0.7978846, %v1214_v39  ;;  %v646_v52 = vadd.f32 %v3305_v62, %v3304_v37  ;;  %v1152_v26 = vmul.f32 %v1120_v60, %v1056_v50 }
  0xc1   : > { %v1340_v14 = vmul.f32 %v1308_v46, %v1084_v48  ;;  %v1215_v0 = vadd.f32 %v1183_v6, %v1055_v55  ;;  %v1021_v2 = vadd.f32 %v989_v61, %v953_v4  ;;  %v2736_v21 = vmul.f32 0.5, %v1055_v55  ;;  %v1444_v48 = vld [vmem:[%s1876_s21 + $0x50] sm:$0xff]  ;;  %v3310_v61 = vld [vmem:[#allocation57_spill] sm:$0xff] }
  0xc2   : > { %v1475_v1 = vadd.f32 %v1443_v31, %v1411_v58  ;;  %1709 = vtanh.f32 %v1246_v7  ;;  %v714_v17 = vadd.f32 %v3306_v29, %v646_v52  ;;  %v1184_v12 = vmul.f32 %v1152_v26, %v1056_v50  ;;  %v3311_v4 = vld [vmem:[#allocation71_spill] sm:$0xff]  ;;  %v3312_v58 = vld [vmem:[#allocation52_spill] sm:$0xff] }
  0xc3   : > { %v1376_v3 = vmul.f32 %v3274_v13, %v1340_v14  ;;  %v1247_v33 = vmul.f32 0.7978846, %v1215_v0  ;;  %v2741_v59 = vadd.f32 %v1954_v45, %v1021_v2  ;;  %v2748_v23 = vmul.f32 0.5, %v1056_v50  ;;  %v3313_v14 = vld [vmem:[#allocation66_spill] sm:$0xff] }
  0xc4   : > { %1507 = vst.msk [vmem:[%s2598_s28 + $0x48] sm:$0xff] %vm236_vm0, %v1475_v1  ;;  %v782_v53 = vadd.f32 %v3307_v22, %v714_v17  ;;  %v854_v55 = vmul.f32 %v1941_v38, %v2657_v51  ;;  %v647_v35 = vadd.f32 %v3309_v47, %v3308_v10  ;;  %v1216_v43 = vadd.f32 %v1184_v12, %v1056_v50  ;;  %v2762_v51 = vld [vmem:[#allocation2 + $0xfa] sm:$0xff]  ;;  %v2778_v12 = vld [vmem:[#allocation2 + $0x10a] sm:$0xff] }
  0xc5   : > { %v1412_v15 = vadd.f32 %v3276_v32, %v1376_v3  ;;  %1711 = vtanh.f32 %v1247_v33  ;;  %v922_v27 = vmul.f32 %v1952_v44, %v2692_v28  ;;  %v1121_v9 = vmul.f32 0.044715, %v2741_v59  ;;  %v3314_v1 = vld [vmem:[#allocation61_spill] sm:$0xff]  ;;  %v3316_v10 = vld [vmem:[#allocation75_spill] sm:$0xff]  ;;  %v3317_v47 = vld [vmem:[#allocation56_spill] sm:$0xff] }
  0xc6   : > { %v886_v5 = vadd.f32 %v854_v55, %v782_v53  ;;  %v990_v39 = vmul.f32 %v2434_v63, %v2743_v16  ;;  %v715_v31 = vadd.f32 %v3310_v61, %v647_v35  ;;  %v1248_v60 = vmul.f32 0.7978846, %v1216_v43 }
  0xc7   : > { %v1708_v46 = vpop.eup %1707  ;;  %v1476_v6 = vadd.f32 %v1444_v48, %v1412_v15  ;;  %v855_v50 = vmul.f32 %v1941_v38, %v2676_v11  ;;  %v648_v7 = vadd.f32 %v3312_v58, %v3311_v4  ;;  %v1153_v62 = vmul.f32 %v1121_v9, %v2741_v59  ;;  %v3315_v48 = vld [vmem:[#allocation70_spill] sm:$0xff] }
  0xc8   : > { %v1309_v37 = vadd.f32 1.0, %v1708_v46  ;;  %v954_v52 = vadd.f32 %v922_v27, %v886_v5  ;;  %v783_v0 = vadd.f32 %v3313_v14, %v715_v31  ;;  %1713 = vtanh.f32 %v1248_v60  ;;  %v1445_v5 = vld [vmem:[%s1876_s21 + $0x58] sm:$0xff]  ;;  %v3318_v31 = vld [vmem:[#allocation65_spill] sm:$0xff] }
  0xc9   : > { %1508 = vst.msk [vmem:[%s2598_s28 + $0x50] sm:$0xff] %vm236_vm0, %v1476_v6  ;;  %v923_v26 = vmul.f32 %v1952_v44, %v2718_v54  ;;  %v991_v2 = vmul.f32 %v2434_v63, %v2762_v51  ;;  %v716_v11 = vadd.f32 %v3314_v1, %v648_v7  ;;  %v1185_v17 = vmul.f32 %v1153_v62, %v2741_v59 }
  0xca   : > { %v1341_v29 = vmul.f32 %v1309_v37, %v1085_v49  ;;  %v1022_v3 = vadd.f32 %v990_v39, %v954_v52  ;;  %v887_v33 = vadd.f32 %v855_v50, %v783_v0  ;;  %v856_v53 = vmul.f32 %v1941_v38, %v2692_v28  ;;  %v3319_v52 = vld [vmem:[#allocation74_spill] sm:$0xff] }
  0xcb   : > { %v784_v22 = vadd.f32 %v3315_v48, %v716_v11  ;;  %v924_v55 = vmul.f32 %v1952_v44, %v2743_v16  ;;  %v649_v35 = vadd.f32 %v3317_v47, %v3316_v10  ;;  %v1217_v43 = vadd.f32 %v1185_v17, %v2741_v59  ;;  %v2799_v11 = vld [vmem:[#allocation2 + $0x112] sm:$0xff] }
  0xcc   : > { %v1710_v15 = vpop.eup %1709  ;;  %v1377_v49 = vmul.f32 %v3274_v13, %v1341_v29  ;;  %v1058_v27 = vadd.f32 %v1954_v45, %v1022_v3  ;;  %v955_v9 = vadd.f32 %v923_v26, %v887_v33  ;;  %v992_v28 = vmul.f32 %v2434_v63, %v2778_v12 }
  0xcd   : > { %v1310_v39 = vadd.f32 1.0, %v1710_v15  ;;  %v888_v61 = vadd.f32 %v856_v53, %v784_v22  ;;  %v717_v46 = vadd.f32 %v3318_v31, %v649_v35  ;;  %v1249_v60 = vmul.f32 0.7978846, %v1217_v43  ;;  %v3320_v22 = vld [vmem:[#allocation79_spill] sm:$0xff]  ;;  %v3321_v53 = vld [vmem:[#allocation60_spill] sm:$0xff] }
  0xce   : > { %v1413_v6 = vadd.f32 %v3276_v32, %v1377_v49  ;;  %v1122_v50 = vmul.f32 0.044715, %v1058_v27  ;;  %v857_v4 = vmul.f32 %v1941_v38, %v2718_v54  ;;  %v1023_v37 = vadd.f32 %v991_v2, %v955_v9 }
  0xcf   : > { %v1712_v58 = vpop.eup %1711  ;;  %v1342_v7 = vmul.f32 %v1310_v39, %v2732_v41  ;;  %v956_v62 = vadd.f32 %v924_v55, %v888_v61  ;;  %v785_v14 = vadd.f32 %v3319_v52, %v717_v46  ;;  %1715 = vtanh.f32 %v1249_v60  ;;  %v1446_v41 = vld [vmem:[%s1876_s21 + $0x60] sm:$0xff]  ;;  %v1447_v61 = vld [vmem:[%s1876_s21 + $0x68] sm:$0xff] }
  0xd0   : > { %v1477_v0 = vadd.f32 %v1445_v5, %v1413_v6  ;;  %v1311_v26 = vadd.f32 1.0, %v1712_v58  ;;  %v1154_v1 = vmul.f32 %v1122_v50, %v1058_v27  ;;  %v1059_v17 = vadd.f32 %v1954_v45, %v1023_v37 }
  0xd1   : > { %v1378_v29 = vmul.f32 %v3274_v13, %v1342_v7  ;;  %v1024_v3 = vadd.f32 %v992_v28, %v956_v62  ;;  %v889_v54 = vadd.f32 %v857_v4, %v785_v14  ;;  %v925_v48 = vmul.f32 %v1952_v44, %v2762_v51  ;;  %v3322_v62 = vld [vmem:[#allocation69_spill] sm:$0xff] }
  0xd2   : > { %1509 = vst.msk [vmem:[%s2598_s28 + $0x58] sm:$0xff] %vm236_vm0, %v1477_v0  ;;  %v1343_v2 = vmul.f32 %v1311_v26, %v2736_v21  ;;  %v1186_v33 = vmul.f32 %v1154_v1, %v1058_v27  ;;  %v650_v55 = vadd.f32 %v3321_v53, %v3320_v22  ;;  %v1714_v10 = vpop.eup %1713  ;;  %v1123_v35 = vmul.f32 0.044715, %v1059_v17  ;;  %v1448_v26 = vld [vmem:[%s1876_s21 + $0x70] sm:$0xff] }
  0xd3   : > { %v1414_v47 = vadd.f32 %v3276_v32, %v1378_v29  ;;  %v1060_v15 = vadd.f32 %v1954_v45, %v1024_v3  ;;  %v993_v49 = vmul.f32 %v2434_v63, %v2799_v11  ;;  %v1312_v21 = vadd.f32 1.0, %v1714_v10  ;;  %v3323_v29 = vld [vmem:[#allocation78_spill] sm:$0xff] }
  0xd4   : > { %v1379_v43 = vmul.f32 %v3274_v13, %v1343_v2  ;;  %v1218_v9 = vadd.f32 %v1186_v33, %v1058_v27  ;;  %v957_v5 = vadd.f32 %v925_v48, %v889_v54  ;;  %v1089_v28 = vmul.f32 0.5, %v2741_v59  ;;  %v2829_v54 = vld [vmem:[#allocation2 + $0x122] sm:$0xff] }
  0xd5   : > { %v1478_v39 = vadd.f32 %v1446_v41, %v1414_v47  ;;  %v1155_v31 = vmul.f32 %v1123_v35, %v1059_v17  ;;  %v1124_v46 = vmul.f32 0.044715, %v1060_v15  ;;  %v1344_v60 = vmul.f32 %v1312_v21, %v2748_v23  ;;  %v3325_v21 = vld [vmem:[#allocation64_spill] sm:$0xff] }
  0xd6   : > { %v1415_v6 = vadd.f32 %v3276_v32, %v1379_v43  ;;  %v1250_v50 = vmul.f32 0.7978846, %v1218_v9  ;;  %v1025_v4 = vadd.f32 %v993_v49, %v957_v5  ;;  %v2822_v58 = vmul.f32 0.5, %v1058_v27  ;;  %v3324_v43 = vld [vmem:[#allocation83_spill] sm:$0xff] }
  0xd7   : > { %1510 = vst.msk [vmem:[%s2598_s28 + $0x60] sm:$0xff] %vm236_vm0, %v1478_v39  ;;  %v1187_v7 = vmul.f32 %v1155_v31, %v1059_v17  ;;  %v1156_v37 = vmul.f32 %v1124_v46, %v1060_v15  ;;  %v718_v52 = vadd.f32 %v3322_v62, %v650_v55  ;;  %v1380_v59 = vmul.f32 %v3274_v13, %v1344_v60 }
  0xd8   : > { %v1479_v14 = vadd.f32 %v1447_v61, %v1415_v6  ;;  %1717 = vtanh.f32 %v1250_v50  ;;  %v1061_v0 = vadd.f32 %v1954_v45, %v1025_v4  ;;  %v858_v27 = vmul.f32 %v1941_v38, %v2743_v16  ;;  %v3326_v6 = vld [vmem:[#allocation73_spill] sm:$0xff]  ;;  %v2851_v50 = vld [vmem:[#allocation2 + $0x12a] sm:$0xff] }
  0xd9   : > { %v1219_v1 = vadd.f32 %v1187_v7, %v1059_v17  ;;  %v1188_v23 = vmul.f32 %v1156_v37, %v1060_v15  ;;  %v786_v3 = vadd.f32 %v3323_v29, %v718_v52  ;;  %v1716_v41 = vpop.eup %1715  ;;  %v1416_v2 = vadd.f32 %v3276_v32, %v1380_v59  ;;  %v3327_v37 = vld [vmem:[#allocation87_spill] sm:$0xff]  ;;  %v1449_v52 = vld [vmem:[%s1876_s21 + $0x78] sm:$0xff]  ;;  %v3329_v59 = vld [vmem:[#allocation82_spill] sm:$0xff] }
  0xda   : > { %1511 = vst.msk [vmem:[%s2598_s28 + $0x68] sm:$0xff] %vm236_vm0, %v1479_v14  ;;  %v2836_v33 = vmul.f32 0.5, %v1059_v17  ;;  %v1125_v48 = vmul.f32 0.044715, %v1061_v0  ;;  %v926_v22 = vmul.f32 %v1952_v44, %v2778_v12  ;;  %v1313_v53 = vadd.f32 1.0, %v1716_v41 }
  0xdb   : > { %v1251_v55 = vmul.f32 0.7978846, %v1219_v1  ;;  %v1220_v10 = vadd.f32 %v1188_v23, %v1060_v15  ;;  %v890_v47 = vadd.f32 %v858_v27, %v786_v3  ;;  %v1480_v35 = vadd.f32 %v1448_v26, %v1416_v2  ;;  %v3330_v27 = vld [vmem:[#allocation77_spill] sm:$0xff] }
  0xdc   : > { %v1157_v49 = vmul.f32 %v1125_v48, %v1061_v0  ;;  %v994_v16 = vmul.f32 %v2434_v63, %v2829_v54  ;;  %v651_v9 = vadd.f32 %v3325_v21, %v3324_v43  ;;  %v1345_v5 = vmul.f32 %v1313_v53, %v1089_v28  ;;  %v3328_v28 = vld [vmem:[#allocation68_spill] sm:$0xff]  ;;  %v3331_v53 = vld [vmem:[#allocation91_spill] sm:$0xff]  ;;  %v3333_v43 = vld [vmem:[#allocation86_spill] sm:$0xff] }
  0xdd   : > { %1719 = vtanh.f32 %v1251_v55  ;;  %v1252_v17 = vmul.f32 0.7978846, %v1220_v10  ;;  %v958_v39 = vadd.f32 %v926_v22, %v890_v47  ;;  %1512 = vst.msk [vmem:[%s2598_s28 + $0x70] sm:$0xff] %vm236_vm0, %v1480_v35  ;;  %v2846_v61 = vmul.f32 0.5, %v1060_v15  ;;  %v2869_v22 = vld [vmem:[#allocation2 + $0x13a] sm:$0xff] }
  0xde   : > { %v2848_v31 = vmul.f32 0.5, %v1061_v0  ;;  %v1189_v46 = vmul.f32 %v1157_v49, %v1061_v0  ;;  %v719_v60 = vadd.f32 %v3326_v6, %v651_v9  ;;  %v1381_v4 = vmul.f32 %v3274_v13, %v1345_v5  ;;  %v3332_v55 = vld [vmem:[#allocation72_spill] sm:$0xff]  ;;  %v3334_v9 = vld [vmem:[#allocation81_spill] sm:$0xff] }
  0xdf   : > { %1721 = vtanh.f32 %v1252_v17  ;;  %v1026_v7 = vadd.f32 %v994_v16, %v958_v39  ;;  %v652_v62 = vadd.f32 %v3328_v28, %v3327_v37  ;;  %v859_v15 = vmul.f32 %v1941_v38, %v2762_v51  ;;  %v2880_v17 = vld [vmem:[#allocation2 + $0x142] sm:$0xff] }
  0xe0   : > { %v1221_v14 = vadd.f32 %v1189_v46, %v1061_v0  ;;  %v787_v26 = vadd.f32 %v3329_v59, %v719_v60  ;;  %v927_v1 = vmul.f32 %v1952_v44, %v2799_v11  ;;  %v1417_v23 = vadd.f32 %v3276_v32, %v1381_v4  ;;  %v2889_v46 = vld [vmem:[%s3145_s1 + $0x8] ss:$0 sm:$0xff] }
  0xe1   : > { %v2864_v29 = vadd.f32 %v1954_v45, %v1026_v7  ;;  %v995_v3 = vmul.f32 %v2434_v63, %v2851_v50  ;;  %v720_v41 = vadd.f32 %v3330_v27, %v652_v62  ;;  %v860_v51 = vmul.f32 %v1941_v38, %v2778_v12  ;;  %v3335_v37 = vld [vmem:[#allocation90_spill] sm:$0xff]  ;;  %v3336_v62 = vld [vmem:[#allocation95_spill] sm:$0xff] }
  0xe2   : > { %v1718_v0 = vpop.eup %1717  ;;  %v1253_v2 = vmul.f32 0.7978846, %v1221_v14  ;;  %v891_v48 = vadd.f32 %v859_v15, %v787_v26  ;;  %v653_v10 = vadd.f32 %v3332_v55, %v3331_v53  ;;  %v1481_v47 = vadd.f32 %v1449_v52, %v1417_v23  ;;  %v3337_v52 = vld [vmem:[#allocation76_spill] sm:$0xff]  ;;  %v1450_v23 = vld [vmem:[%s1876_s21 + $0x80] sm:$0xff] }
  0xe3   : > { %v1314_v35 = vadd.f32 1.0, %v1718_v0  ;;  %v1126_v49 = vmul.f32 0.044715, %v2864_v29  ;;  %v928_v63 = vmul.f32 %v1952_v44, %v2829_v54  ;;  %v788_v21 = vadd.f32 %v3333_v43, %v720_v41 }
  0xe4   : > { %1723 = vtanh.f32 %v1253_v2  ;;  %v959_v16 = vadd.f32 %v927_v1, %v891_v48  ;;  %v721_v5 = vadd.f32 %v3334_v9, %v653_v10  ;;  %1513 = vst.msk [vmem:[%s2598_s28 + $0x78] sm:$0xff] %vm236_vm0, %v1481_v47  ;;  %v996_v6 = vmul.f32 %v2889_v46, %v2869_v22 }
  0xe5   : > { %v1346_v12 = vmul.f32 %v1314_v35, %v2822_v58  ;;  %v1158_v39 = vmul.f32 %v1126_v49, %v2864_v29  ;;  %v861_v60 = vmul.f32 %v1941_v38, %v2799_v11  ;;  %v892_v7 = vadd.f32 %v860_v51, %v788_v21  ;;  %v3338_v51 = vld [vmem:[#allocation85_spill] sm:$0xff] }
  0xe6   : > { %v1027_v4 = vadd.f32 %v995_v3, %v959_v16  ;;  %v789_v28 = vadd.f32 %v3335_v37, %v721_v5  ;;  %v654_v58 = vadd.f32 %v3337_v52, %v3336_v62  ;;  %v929_v15 = vmul.f32 %v1952_v44, %v2851_v50 }
  0xe7   : > { %v1720_v14 = vpop.eup %1719  ;;  %v1382_v59 = vmul.f32 %v3274_v13, %v1346_v12  ;;  %v1190_v26 = vmul.f32 %v1158_v39, %v2864_v29  ;;  %v997_v1 = vmul.f32 %v2889_v46, %v2880_v17  ;;  %v960_v27 = vadd.f32 %v928_v63, %v892_v7  ;;  %v3339_v39 = vld [vmem:[#allocation94_spill] sm:$0xff] }
  0xe8   : > { %v1315_v11 = vadd.f32 1.0, %v1720_v14  ;;  %v1063_v3 = vadd.f32 %v1954_v45, %v1027_v4  ;;  %v893_v41 = vadd.f32 %v861_v60, %v789_v28  ;;  %v722_v53 = vadd.f32 %v3338_v51, %v654_v58  ;;  %v1452_v14 = vld [vmem:[%s1876_s21 + $0x90] sm:$0xff] }
  0xe9   : > { %v1722_v0 = vpop.eup %1721  ;;  %v1418_v2 = vadd.f32 %v3276_v32, %v1382_v59  ;;  %v1222_v48 = vadd.f32 %v1190_v26, %v2864_v29  ;;  %v862_v55 = vmul.f32 %v1941_v38, %v2829_v54  ;;  %v930_v49 = vmul.f32 %v1952_v44, %v2869_v22  ;;  %v2917_v54 = vld [vmem:[#allocation2 + $0x152] sm:$0xff] }
  0xea   : > { %v1347_v10 = vmul.f32 %v1315_v11, %v2836_v33  ;;  %v1316_v47 = vadd.f32 1.0, %v1722_v0  ;;  %v1127_v35 = vmul.f32 0.044715, %v1063_v3  ;;  %v1028_v43 = vadd.f32 %v996_v6, %v960_v27  ;;  %v1451_v33 = vld [vmem:[%s1876_s21 + $0x88] sm:$0xff]  ;;  %v3340_v6 = vld [vmem:[#allocation80_spill] sm:$0xff] }
  0xeb   : > { %v1482_v63 = vadd.f32 %v1450_v23, %v1418_v2  ;;  %v1254_v16 = vmul.f32 0.7978846, %v1222_v48  ;;  %v961_v21 = vadd.f32 %v929_v15, %v893_v41  ;;  %v790_v60 = vadd.f32 %v3339_v39, %v722_v53 }
  0xec   : > { %v1383_v9 = vmul.f32 %v3274_v13, %v1347_v10  ;;  %v1348_v5 = vmul.f32 %v1316_v47, %v2846_v61  ;;  %v1159_v12 = vmul.f32 %v1127_v35, %v1063_v3  ;;  %v1064_v4 = vadd.f32 %v1954_v45, %v1028_v43  ;;  %v3341_v10 = vld [vmem:[#allocation89_spill] sm:$0xff] }
  0xed   : > { %1514 = vst.msk [vmem:[%s2598_s28 + $0x80] sm:$0xff] %vm236_vm0, %v1482_v63  ;;  %1725 = vtanh.f32 %v1254_v16  ;;  %v1029_v7 = vadd.f32 %v997_v1, %v961_v21  ;;  %v655_v37 = vadd.f32 %v3340_v6, %v2405_v19  ;;  %v894_v58 = vadd.f32 %v862_v55, %v790_v60 }
  0xee   : > { %v1724_v28 = vpop.eup %1723  ;;  %v1419_v62 = vadd.f32 %v3276_v32, %v1383_v9  ;;  %v1384_v61 = vmul.f32 %v3274_v13, %v1348_v5  ;;  %v1191_v52 = vmul.f32 %v1159_v12, %v1063_v3  ;;  %v1128_v26 = vmul.f32 0.044715, %v1064_v4  ;;  %v2945_v9 = vld [vmem:[#allocation2 + $0x15a] sm:$0xff] }
  0xef   : > { %v1317_v59 = vadd.f32 1.0, %v1724_v28  ;;  %v1065_v15 = vadd.f32 %v1954_v45, %v1029_v7  ;;  %v998_v23 = vmul.f32 %v2889_v46, %v2917_v54  ;;  %v962_v27 = vadd.f32 %v930_v49, %v894_v58  ;;  %v3342_v49 = vld [vmem:[#allocation98_spill] sm:$0xff] }
  0xf0   : > { %v1483_v1 = vadd.f32 %v1451_v33, %v1419_v62  ;;  %v1420_v11 = vadd.f32 %v3276_v32, %v1384_v61  ;;  %v1223_v19 = vadd.f32 %v1191_v52, %v1063_v3  ;;  %v1094_v0 = vmul.f32 0.5, %v2864_v29 }
  0xf1   : > { %v1349_v41 = vmul.f32 %v1317_v59, %v2848_v31  ;;  %v1160_v2 = vmul.f32 %v1128_v26, %v1064_v4  ;;  %v1129_v48 = vmul.f32 0.044715, %v1065_v15  ;;  %v1030_v55 = vadd.f32 %v998_v23, %v962_v27  ;;  %v1453_v31 = vld [vmem:[%s1876_s21 + $0x98] sm:$0xff] }
  0xf2   : > { %1515 = vst.msk [vmem:[%s2598_s28 + $0x88] sm:$0xff] %vm236_vm0, %v1483_v1  ;;  %v1484_v51 = vadd.f32 %v1452_v14, %v1420_v11  ;;  %v1255_v53 = vmul.f32 0.7978846, %v1223_v19  ;;  %v723_v47 = vadd.f32 %v3341_v10, %v655_v37  ;;  %v2938_v63 = vmul.f32 0.5, %v1063_v3  ;;  %v3343_v37 = vld [vmem:[#allocation84_spill] sm:$0xff] }
  0xf3   : > { %v1385_v35 = vmul.f32 %v3274_v13, %v1349_v41  ;;  %v1192_v16 = vmul.f32 %v1160_v2, %v1064_v4  ;;  %v1161_v43 = vmul.f32 %v1129_v48, %v1065_v15  ;;  %v1066_v29 = vadd.f32 %v1954_v45, %v1030_v55  ;;  %v2966_v48 = vld [vmem:[#allocation2 + $0x16a] sm:$0xff] }
  0xf4   : > { %1516 = vst.msk [vmem:[%s2598_s28 + $0x90] sm:$0xff] %vm236_vm0, %v1484_v51  ;;  %1727 = vtanh.f32 %v1255_v53  ;;  %v791_v21 = vadd.f32 %v3342_v49, %v723_v47  ;;  %v863_v5 = vmul.f32 %v1941_v38, %v2851_v50  ;;  %v2950_v39 = vmul.f32 0.5, %v1064_v4  ;;  %v3347_v49 = vld [vmem:[#allocation92_spill] sm:$0xff] }
  0xf5   : > { %v1421_v12 = vadd.f32 %v3276_v32, %v1385_v35  ;;  %v1224_v3 = vadd.f32 %v1192_v16, %v1064_v4  ;;  %v1193_v60 = vmul.f32 %v1161_v43, %v1065_v15  ;;  %v1130_v33 = vmul.f32 0.044715, %v1066_v29  ;;  %v3344_v4 = vld [vmem:[#allocation93_spill] sm:$0xff] }
  0xf6   : > { %v895_v7 = vadd.f32 %v863_v5, %v791_v21  ;;  %v931_v6 = vmul.f32 %v1952_v44, %v2880_v17  ;;  %v656_v28 = vadd.f32 %v3343_v37, %v2419_v42  ;;  %v999_v50 = vmul.f32 %v2889_v46, %v2945_v9  ;;  %v1454_v35 = vld [vmem:[%s1876_s21 + $0xa0] sm:$0xff] }
  0xf7   : > { %v1726_v62 = vpop.eup %1725  ;;  %v1485_v61 = vadd.f32 %v1453_v31, %v1421_v12  ;;  %v1256_v52 = vmul.f32 0.7978846, %v1224_v3  ;;  %v1225_v58 = vadd.f32 %v1193_v60, %v1065_v15  ;;  %v1162_v59 = vmul.f32 %v1130_v33, %v1066_v29  ;;  %v3346_v16 = vld [vmem:[#allocation97_spill] sm:$0xff] }
  0xf8   : > { %v1318_v14 = vadd.f32 1.0, %v1726_v62  ;;  %v963_v26 = vadd.f32 %v931_v6, %v895_v7  ;;  %v724_v23 = vadd.f32 %v3344_v4, %v656_v28  ;;  %v2961_v1 = vmul.f32 0.5, %v1065_v15  ;;  %v3345_v15 = vld [vmem:[#allocation88_spill] sm:$0xff] }
  0xf9   : > { %1517 = vst.msk [vmem:[%s2598_s28 + $0x98] sm:$0xff] %vm236_vm0, %v1485_v61  ;;  %1729 = vtanh.f32 %v1256_v52  ;;  %v1257_v11 = vmul.f32 0.7978846, %v1225_v58  ;;  %v864_v42 = vmul.f32 %v1941_v38, %v2869_v22  ;;  %v1194_v27 = vmul.f32 %v1162_v59, %v1066_v29  ;;  %v2991_v6 = vld [vmem:[#allocation2 + $0x172] sm:$0xff] }
  0xfa   : > { %v1350_v19 = vmul.f32 %v1318_v14, %v1094_v0  ;;  %v1031_v41 = vadd.f32 %v999_v50, %v963_v26  ;;  %v792_v2 = vadd.f32 %v2416_v18, %v724_v23  ;;  %v2968_v51 = vmul.f32 0.5, %v1066_v29  ;;  %v2999_v50 = vld [vmem:[#allocation2 + $0x182] sm:$0xff] }
  0xfb   : > { %1731 = vtanh.f32 %v1257_v11  ;;  %v932_v53 = vmul.f32 %v1952_v44, %v2917_v54  ;;  %v657_v55 = vadd.f32 %v3345_v15, %v2436_v8  ;;  %v1226_v47 = vadd.f32 %v1194_v27, %v1066_v29  ;;  %v1455_v11 = vld [vmem:[%s1876_s21 + $0xa8] sm:$0xff] }
  0xfc   : > { %v1386_v10 = vmul.f32 %v3274_v13, %v1350_v19  ;;  %v2976_v22 = vadd.f32 %v1954_v45, %v1031_v41  ;;  %v896_v0 = vadd.f32 %v864_v42, %v792_v2  ;;  %v1000_v18 = vmul.f32 %v2889_v46, %v2966_v48 }
  0xfd   : > { %v725_v43 = vadd.f32 %v3346_v16, %v657_v55  ;;  %v865_v31 = vmul.f32 %v1941_v38, %v2880_v17  ;;  %v658_v21 = vadd.f32 %v3347_v49, %v2445_v34  ;;  %v1258_v29 = vmul.f32 0.7978846, %v1226_v47 }
  0xfe   : > { %v1728_v8 = vpop.eup %1727  ;;  %v1422_v5 = vadd.f32 %v3276_v32, %v1386_v10  ;;  %v1131_v12 = vmul.f32 0.044715, %v2976_v22  ;;  %v933_v3 = vmul.f32 %v1952_v44, %v2945_v9  ;;  %v964_v33 = vadd.f32 %v932_v53, %v896_v0 }
  0xff   : > { %v1319_v60 = vadd.f32 1.0, %v1728_v8  ;;  %v793_v7 = vadd.f32 %v2427_v24, %v725_v43  ;;  %v726_v17 = vadd.f32 %v2413_v36, %v658_v21  ;;  %1733 = vtanh.f32 %v1258_v29  ;;  %v1456_v21 = vld [vmem:[%s1876_s21 + $0xb0] sm:$0xff] }
 0x100   : > { %v1486_v37 = vadd.f32 %v1454_v35, %v1422_v5  ;;  %v1163_v34 = vmul.f32 %v1131_v12, %v2976_v22  ;;  %v866_v28 = vmul.f32 %v1941_v38, %v2917_v54  ;;  %v1032_v61 = vadd.f32 %v1000_v18, %v964_v33  ;;  %v3348_v54 = vld [vmem:[#allocation96_spill] sm:$0xff] }
 0x101   : > { %v1351_v62 = vmul.f32 %v1319_v60, %v2938_v63  ;;  %v897_v52 = vadd.f32 %v865_v31, %v793_v7  ;;  %v794_v58 = vadd.f32 %v2439_v25, %v726_v17  ;;  %v1001_v36 = vmul.f32 %v2889_v46, %v2991_v6  ;;  %v3029_v31 = vld [vmem:[#allocation2 + $0x18a] sm:$0xff]  ;;  %v1457_v7 = vld [vmem:[%s1876_s21 + $0xb8] sm:$0xff] }
 0x102   : > { %1518 = vst.msk [vmem:[%s2598_s28 + $0xa0] sm:$0xff] %vm236_vm0, %v1486_v37  ;;  %v1195_v24 = vmul.f32 %v1163_v34, %v2976_v22  ;;  %v934_v14 = vmul.f32 %v1952_v44, %v2966_v48  ;;  %v659_v59 = vadd.f32 %v3348_v54, %v2447_v20  ;;  %v3012_v25 = vadd.f32 %v1954_v45, %v1032_v61  ;;  %v3349_v61 = vld [vmem:[#allocation12_spill] sm:$0xff] }
 0x103   : > { %v1730_v63 = vpop.eup %1729  ;;  %v1387_v26 = vmul.f32 %v3274_v13, %v1351_v62  ;;  %v965_v4 = vadd.f32 %v933_v3, %v897_v52  ;;  %v898_v23 = vadd.f32 %v866_v28, %v794_v58  ;;  %v1002_v27 = vmul.f32 %v2889_v46, %v2999_v50  ;;  %v1750_v62 = vld [vmem:[#allocation2 + $0x181] sm:$0xff] }
 0x104   : > { %v1320_v42 = vadd.f32 1.0, %v1730_v63  ;;  %v1227_v19 = vadd.f32 %v1195_v24, %v2976_v22  ;;  %v727_v41 = vadd.f32 %v2423_v57, %v659_v59  ;;  %v1132_v53 = vmul.f32 0.044715, %v3012_v25 }
 0x105   : > { %v1732_v2 = vpop.eup %1731  ;;  %v1423_v20 = vadd.f32 %v3276_v32, %v1387_v26  ;;  %v1033_v15 = vadd.f32 %v1001_v36, %v965_v4  ;;  %v867_v55 = vmul.f32 %v1941_v38, %v2945_v9  ;;  %v966_v35 = vadd.f32 %v934_v14, %v898_v23  ;;  %v3350_v26 = vld [vmem:[#allocation15_spill] sm:$0xff] }
 0x106   : > { %v1352_v10 = vmul.f32 %v1320_v42, %v2950_v39  ;;  %v1321_v47 = vadd.f32 1.0, %v1732_v2  ;;  %v1259_v0 = vmul.f32 0.7978846, %v1227_v19  ;;  %v1164_v16 = vmul.f32 %v1132_v53, %v3012_v25  ;;  %v3351_v42 = vld [vmem:[#allocation99_spill] sm:$0xff] }
 0x107   : > { %v1487_v18 = vadd.f32 %v1455_v11, %v1423_v20  ;;  %v3026_v57 = vadd.f32 %v1954_v45, %v1033_v15  ;;  %v795_v43 = vadd.f32 %v2450_v40, %v727_v41  ;;  %v1034_v39 = vadd.f32 %v1002_v27, %v966_v35  ;;  %v1751_v2 = vld [vmem:[#allocation2 + $0x171] sm:$0xff]  ;;  %v3352_v20 = vld [vmem:[#allocation9_spill] sm:$0xff] }
 0x108   : > { %v1388_v49 = vmul.f32 %v3274_v13, %v1352_v10  ;;  %v1353_v9 = vmul.f32 %v1321_v47, %v2961_v1  ;;  %1735 = vtanh.f32 %v1259_v0  ;;  %v1196_v8 = vmul.f32 %v1164_v16, %v3012_v25 }
 0x109   : > { %1519 = vst.msk [vmem:[%s2598_s28 + $0xa8] sm:$0xff] %vm236_vm0, %v1487_v18  ;;  %v1133_v5 = vmul.f32 0.044715, %v3026_v57  ;;  %v899_v29 = vadd.f32 %v867_v55, %v795_v43  ;;  %v935_v40 = vmul.f32 %v1952_v44, %v2991_v6  ;;  %v1734_v12 = vpop.eup %1733  ;;  %v3043_v1 = vadd.f32 %v1954_v45, %v1034_v39  ;;  %v1458_v55 = vld [vmem:[%s1876_s21 + $0xc0] sm:$0xff] }
 0x10a   : > { %v1424_v3 = vadd.f32 %v3276_v32, %v1388_v49  ;;  %v1389_v60 = vmul.f32 %v3274_v13, %v1353_v9  ;;  %v1003_v33 = vmul.f32 %v2889_v46, %v3029_v31  ;;  %v1322_v17 = vadd.f32 1.0, %v1734_v12  ;;  %v3353_v49 = vld [vmem:[#allocation16_spill] sm:$0xff] }
 0x10b   : > { %v1228_v37 = vadd.f32 %v1196_v8, %v3012_v25  ;;  %v1165_v34 = vmul.f32 %v1133_v5, %v3026_v57  ;;  %v967_v28 = vadd.f32 %v935_v40, %v899_v29  ;;  %v696_v52 = vmul.f32 %v1750_v62, %v3349_v61  ;;  %v832_v39 = vld [vmem:[#allocation2 + $0x19a] sm:$0xff] }
 0x10c   : > { %v1488_v58 = vadd.f32 %v1456_v21, %v1424_v3  ;;  %v1425_v24 = vadd.f32 %v3276_v32, %v1389_v60  ;;  %v1134_v36 = vmul.f32 0.044715, %v3043_v1  ;;  %v1354_v14 = vmul.f32 %v1322_v17, %v2968_v51 }
 0x10d   : > { %v1260_v54 = vmul.f32 0.7978846, %v1228_v37  ;;  %v1197_v59 = vmul.f32 %v1165_v34, %v3026_v57  ;;  %v1035_v63 = vadd.f32 %v1003_v33, %v967_v28  ;;  %v557_v4 = vadd.f32 %v3350_v26, %v2441_v30  ;;  %v1752_v30 = vld [vmem:[#allocation2 + $0x189] sm:$0xff]  ;;  %v3354_v37 = vld [vmem:[#allocation17_spill] sm:$0xff] }
 0x10e   : > { %1520 = vst.msk [vmem:[%s2598_s28 + $0xb0] sm:$0xff] %vm236_vm0, %v1488_v58  ;;  %v1489_v23 = vadd.f32 %v1457_v7, %v1425_v24  ;;  %v1166_v11 = vmul.f32 %v1134_v36, %v3043_v1  ;;  %v660_v19 = vadd.f32 %v3351_v42, %v2455_v56  ;;  %v1390_v27 = vmul.f32 %v3274_v13, %v1354_v14 }
 0x10f   : > { %1737 = vtanh.f32 %v1260_v54  ;;  %v1229_v51 = vadd.f32 %v1197_v59, %v3026_v57  ;;  %v3065_v41 = vadd.f32 %v1954_v45, %v1035_v63  ;;  %v629_v53 = vmul.f32 %v1751_v2, %v3352_v20  ;;  %v1460_v20 = vld [vmem:[%s1876_s21 + $0xd0] sm:$0xff] }
 0x110   : > { %v697_v15 = vmul.f32 %v1752_v30, %v3349_v61  ;;  %1521 = vst.msk [vmem:[%s2598_s28 + $0xb8] sm:$0xff] %vm236_vm0, %v1489_v23  ;;  %v1198_v10 = vmul.f32 %v1166_v11, %v3043_v1  ;;  %v728_v56 = vadd.f32 %v696_v52, %v660_v19  ;;  %v1426_v47 = vadd.f32 %v3276_v32, %v1390_v27  ;;  %v1459_v52 = vld [vmem:[%s1876_s21 + $0xc8] sm:$0xff] }
 0x111   : > { %v1099_v0 = vmul.f32 0.5, %v2976_v22  ;;  %v1261_v35 = vmul.f32 0.7978846, %v1229_v51  ;;  %v1135_v18 = vmul.f32 0.044715, %v3065_v41  ;;  %v868_v21 = vmul.f32 %v1941_v38, %v2966_v48 }
 0x112   : > { %v1736_v16 = vpop.eup %1735  ;;  %v1230_v43 = vadd.f32 %v1198_v10, %v3043_v1  ;;  %v796_v9 = vadd.f32 %v3353_v49, %v728_v56  ;;  %v661_v8 = vadd.f32 %v629_v53, %v557_v4  ;;  %v1490_v5 = vadd.f32 %v1458_v55, %v1426_v47 }
 0x113   : > { %v1323_v29 = vadd.f32 1.0, %v1736_v16  ;;  %1739 = vtanh.f32 %v1261_v35  ;;  %v1167_v40 = vmul.f32 %v1135_v18, %v3065_v41  ;;  %v936_v3 = vmul.f32 %v1952_v44, %v2999_v50  ;;  %v833_v50 = vld [vmem:[#allocation2 + $0x1a2] sm:$0xff]  ;;  %v1461_v35 = vld [vmem:[%s1876_s21 + $0xd8] sm:$0xff] }
 0x114   : > { %v1262_v22 = vmul.f32 0.7978846, %v1230_v43  ;;  %v900_v12 = vadd.f32 %v868_v21, %v796_v9  ;;  %v729_v60 = vadd.f32 %v697_v15, %v661_v8  ;;  %1522 = vst.msk [vmem:[%s2598_s28 + $0xc0] sm:$0xff] %vm236_vm0, %v1490_v5  ;;  %v1004_v48 = vmul.f32 %v2889_v46, %v832_v39  ;;  %v1462_v21 = vld [vmem:[%s1876_s21 + $0xe0] sm:$0xff] }
 0x115   : > { %v1355_v33 = vmul.f32 %v1323_v29, %v1099_v0  ;;  %v1199_v7 = vmul.f32 %v1167_v40, %v3065_v41  ;;  %v869_v28 = vmul.f32 %v1941_v38, %v2991_v6  ;;  %v937_v36 = vmul.f32 %v1952_v44, %v3029_v31 }
 0x116   : > { %1741 = vtanh.f32 %v1262_v22  ;;  %v968_v17 = vadd.f32 %v936_v3, %v900_v12  ;;  %v797_v34 = vadd.f32 %v3354_v37, %v729_v60  ;;  %v1100_v59 = vmul.f32 0.5, %v3012_v25 }
 0x117   : > { %v1391_v62 = vmul.f32 %v3274_v13, %v1355_v33  ;;  %v1231_v61 = vadd.f32 %v1199_v7, %v3065_v41  ;;  %v1005_v4 = vmul.f32 %v2889_v46, %v833_v50  ;;  %v1101_v44 = vmul.f32 0.5, %v3026_v57  ;;  %v1463_v33 = vld [vmem:[%s1876_s21 + $0xe8] sm:$0xff] }
 0x118   : > { %v1036_v58 = vadd.f32 %v1004_v48, %v968_v17  ;;  %v901_v24 = vadd.f32 %v869_v28, %v797_v34  ;;  %v1102_v55 = vmul.f32 0.5, %v3043_v1  ;;  %v1103_v8 = vmul.f32 0.5, %v3065_v41 }
 0x119   : > { %v1738_v14 = vpop.eup %1737  ;;  %v1427_v54 = vadd.f32 %v3276_v32, %v1391_v62  ;;  %v1263_v63 = vmul.f32 0.7978846, %v1231_v61  ;;  %v1464_v61 = vld [vmem:[%s1876_s21 + $0xf0] sm:$0xff] }
 0x11a   : > { %v1324_v26 = vadd.f32 1.0, %v1738_v14  ;;  %v1072_v38 = vadd.f32 %v1954_v45, %v1036_v58  ;;  %v969_v6 = vadd.f32 %v937_v36, %v901_v24 }
 0x11b   : > { %v1491_v23 = vadd.f32 %v1459_v52, %v1427_v54  ;;  %1743 = vtanh.f32 %v1263_v63  ;;  %v1465_v54 = vld [vmem:[%s1876_s21 + $0xf8] sm:$0xff] }
 0x11c   : > { %v1356_v11 = vmul.f32 %v1324_v26, %v1100_v59  ;;  %v1136_v42 = vmul.f32 0.044715, %v1072_v38  ;;  %v1037_v19 = vadd.f32 %v1005_v4, %v969_v6  ;;  %v1104_v17 = vmul.f32 0.5, %v1072_v38 }
 0x11d   : > { %v1740_v27 = vpop.eup %1739  ;;  %1523 = vst.msk [vmem:[%s2598_s28 + $0xc8] sm:$0xff] %vm236_vm0, %v1491_v23 }
 0x11e   : > { %v1392_v25 = vmul.f32 %v3274_v13, %v1356_v11  ;;  %v1325_v31 = vadd.f32 1.0, %v1740_v27  ;;  %v1168_v51 = vmul.f32 %v1136_v42, %v1072_v38  ;;  %v1073_v2 = vadd.f32 %v1954_v45, %v1037_v19 }
 0x120   : > { %v1742_v46 = vpop.eup %1741  ;;  %v1428_v53 = vadd.f32 %v3276_v32, %v1392_v25  ;;  %v1357_v30 = vmul.f32 %v1325_v31, %v1101_v44  ;;  %v1200_v15 = vmul.f32 %v1168_v51, %v1072_v38  ;;  %v1137_v56 = vmul.f32 0.044715, %v1073_v2 }
 0x121   : > { %v1326_v10 = vadd.f32 1.0, %v1742_v46  ;;  %v1105_v50 = vmul.f32 0.5, %v1073_v2 }
 0x122   : > { %v1492_v57 = vadd.f32 %v1460_v20, %v1428_v53  ;;  %v1393_v47 = vmul.f32 %v3274_v13, %v1357_v30  ;;  %v1232_v0 = vadd.f32 %v1200_v15, %v1072_v38  ;;  %v1169_v16 = vmul.f32 %v1137_v56, %v1073_v2 }
 0x123   : > { %v1358_v18 = vmul.f32 %v1326_v10, %v1102_v55 }
 0x124   : > { %1524 = vst.msk [vmem:[%s2598_s28 + $0xd0] sm:$0xff] %vm236_vm0, %v1492_v57  ;;  %v1429_v45 = vadd.f32 %v3276_v32, %v1393_v47  ;;  %v1264_v43 = vmul.f32 0.7978846, %v1232_v0  ;;  %v1201_v9 = vmul.f32 %v1169_v16, %v1073_v2 }
 0x125   : > { %v1744_v49 = vpop.eup %1743  ;;  %v1394_v1 = vmul.f32 %v3274_v13, %v1358_v18 }
 0x126   : > { %v1493_v39 = vadd.f32 %v1461_v35, %v1429_v45  ;;  %v1327_v5 = vadd.f32 1.0, %v1744_v49  ;;  %1745 = vtanh.f32 %v1264_v43  ;;  %v1233_v40 = vadd.f32 %v1201_v9, %v1073_v2 }
 0x127   : > { %v1430_v29 = vadd.f32 %v3276_v32, %v1394_v1 }
 0x128   : > { %1525 = vst.msk [vmem:[%s2598_s28 + $0xd8] sm:$0xff] %vm236_vm0, %v1493_v39  ;;  %v1359_v22 = vmul.f32 %v1327_v5, %v1103_v8  ;;  %v1265_v3 = vmul.f32 0.7978846, %v1233_v40 }
 0x129   : > { %v1494_v12 = vadd.f32 %v1462_v21, %v1430_v29 }
 0x12a   : > { %v1395_v60 = vmul.f32 %v3274_v13, %v1359_v22  ;;  %1747 = vtanh.f32 %v1265_v3 }
 0x12b   : > { %1526 = vst.msk [vmem:[%s2598_s28 + $0xe0] sm:$0xff] %vm236_vm0, %v1494_v12 }
 0x12c   : > { %v1431_v41 = vadd.f32 %v3276_v32, %v1395_v60 }
 0x12e   : > { %v1495_v7 = vadd.f32 %v1463_v33, %v1431_v41 }
 0x130   : > { %v1746_v48 = vpop.eup %1745  ;;  %1527 = vst.msk [vmem:[%s2598_s28 + $0xe8] sm:$0xff] %vm236_vm0, %v1495_v7 }
 0x131   : > { %v1328_v37 = vadd.f32 1.0, %v1746_v48 }
 0x133   : > { %v1360_v34 = vmul.f32 %v1328_v37, %v1104_v17 }
 0x134   : > { %v1748_v28 = vpop.eup %1747 }
 0x135   : > { %v1396_v62 = vmul.f32 %v3274_v13, %v1360_v34  ;;  %v1329_v52 = vadd.f32 1.0, %v1748_v28 }
 0x137   : > { %v1432_v58 = vadd.f32 %v3276_v32, %v1396_v62  ;;  %v1361_v24 = vmul.f32 %v1329_v52, %v1105_v50 }
 0x139   : > { %v1496_v36 = vadd.f32 %v1464_v61, %v1432_v58  ;;  %v1397_v14 = vmul.f32 %v3274_v13, %v1361_v24 }
 0x13b   : > { %1528 = vst.msk [vmem:[%s2598_s28 + $0xf0] sm:$0xff] %vm236_vm0, %v1496_v36  ;;  %v1433_v59 = vadd.f32 %v3276_v32, %v1397_v14 }
 0x13d   : > { %v1497_v63 = vadd.f32 %v1465_v54, %v1433_v59 }
 0x13f   : > { %1529 = vst.msk [vmem:[%s2598_s28 + $0xf8] sm:$0xff] %vm236_vm0, %v1497_v63 }
 0x140 PF: > { %s13_s14 = sadd.s32 1, %s1775_s14   ;;  %s3355_s12 = smov %s1771_s13 }
 0x141   : > { %p10_p5 = scmp.ge.s32.totalorder %s13_s14, 4   ;;  %s3356_s13 = smov %s3358_s15 }
 0x143   :  { %12 = sbr.rel (!%p10_p5) target bundleno = 2 (0x2), region = 70 }

</bundles_post_ra>
